<compile_context>
chip_gen: v7x
topology: tpu7x:2x2x1
jax: 0.10.0
libtpu: 0.0.40
codegen_flags: <defaults>
</compile_context>

<pallas_src>
import functools

import jax
import jax.numpy as jnp
from jax import lax
from jax.experimental import pallas as pl
from jax.experimental.pallas import tpu as pltpu


def _gamma_volatility_kernel(t_ref, p_ref, o_ref, *, hidden):
    """t_ref: (TR, 128) VMEM (batch dense), p_ref: (7*H+2,) SMEM, o_ref: (TR, 128)."""
    H = hidden
    t = t_ref[...]                                   # (TR, 128) f32, batch dense

    gamma = jnp.zeros_like(t)
    d_gamma = jnp.zeros_like(t)
    eta_raw = jnp.zeros_like(t)

    # Fully unrolled loop over hidden units; all params are cheap SMEM scalar loads
    # with static offsets.  Live set: t + 3 accumulators + 2 temporaries = 6 dense
    # (TR, 128) tensors -> TR/8 vregs each (no spills for TR <= 64).
    for j in range(H):
        w1 = p_ref[j]                # > 0
        b1 = p_ref[H + j]
        w2 = p_ref[2 * H + j]        # > 0
        w1w2 = p_ref[3 * H + j]      # precomputed w1 * w2
        v1 = p_ref[4 * H + j]
        c1 = p_ref[5 * H + j]
        v2 = p_ref[6 * H + j]

        h = jnp.tanh(w1 * t + b1)                    # gamma-net hidden unit
        he = jnp.tanh(v1 * t + c1)                   # eta-net hidden unit

        gamma = gamma + w2 * h
        d_gamma = d_gamma + w1w2 * (1.0 - h * h)     # exact d gamma / d t
        eta_raw = eta_raw + v2 * he

    b2 = p_ref[7 * H]
    c2 = p_ref[7 * H + 1]
    gamma = gamma + b2
    eta_raw = eta_raw + c2

    # eta = softplus(eta_raw)  (numerically stable form)
    eta = jnp.maximum(eta_raw, 0.0) + jnp.log1p(jnp.exp(-jnp.abs(eta_raw)))
    # sigma2 = sigmoid(gamma)  (stable tanh form)
    sigma2 = 0.5 * (jnp.tanh(0.5 * gamma) + 1.0)

    o_ref[...] = jnp.sqrt(sigma2 * d_gamma * eta)


def _pack_params(p):
    """Flatten all parameters into one (7*H + 2,) f32 array for SMEM."""
    def row(x):
        return jnp.asarray(x, jnp.float32).reshape(-1)

    w1 = row(p["w1"])
    w2 = row(p["w2"])
    return jnp.concatenate(
        [
            w1,                # [0*H, 1*H)
            row(p["b1"]),      # [1*H, 2*H)
            w2,                # [2*H, 3*H)
            w1 * w2,           # [3*H, 4*H)  precomputed (loop invariant)
            row(p["v1"]),      # [4*H, 5*H)
            row(p["c1"]),      # [5*H, 6*H)
            row(p["v2"]),      # [6*H, 7*H)
            row(p["b2"]),      # [7*H]
            row(p["c2"]),      # [7*H + 1]
        ]
    )


def gamma_volatility(t, params, *, rows_per_tile=32):
    """t: (B, 1) float32.  Returns sqrt(sigma2(gamma) * d_gamma * eta), shape (B, 1)."""
    B = t.shape[0]
    H = params["w1"].shape[-1]
    LANES = 128

    # --- grid / tile shaping -------------------------------------------------
    R = max(pl.cdiv(B, LANES), 1)                # 128-wide rows needed
    if R <= rows_per_tile:
        TR = R                                   # single tile (best for 1-TC v5e/v6e)
        n_tiles = 1
    else:
        TR = rows_per_tile                       # multiple of 8; ~24 live vregs
        n_tiles = pl.cdiv(R, TR)
        if n_tiles % 2 == 1:
            n_tiles += 1                         # even grid -> balanced v7x dual-TC split
    R_pad = n_tiles * TR
    B_pad = R_pad * LANES

    # --- dense batch layout: batch fills sublanes AND lanes -------------------
    t_flat = t.reshape(-1).astype(jnp.float32)
    if B_pad != B:
        t_flat = jnp.pad(t_flat, (0, B_pad - B))  # padded lanes are finite, sliced off
    t_dense = t_flat.reshape(R_pad, LANES)

    pk = _pack_params(params)                     # (7*H + 2,) f32 -> SMEM

    cost = pl.CostEstimate(
        flops=12 * H * B_pad,
        transcendentals=(2 * H + 4) * B_pad,
        bytes_accessed=8 * B_pad + 4 * (7 * H + 2),
    )

    out = pl.pallas_call(
        functools.partial(_gamma_volatility_kernel, hidden=H),
        out_shape=jax.ShapeDtypeStruct((R_pad, LANES), jnp.float32),
        grid_spec=pltpu.PrefetchScalarGridSpec(
            num_scalar_prefetch=0,
            grid=(n_tiles,),
            in_specs=[
                pl.BlockSpec((TR, LANES), lambda i: (i, 0)),           # t, dense
                pl.BlockSpec(memory_space=pltpu.MemorySpace.SMEM),     # params, scalars
            ],
            out_specs=pl.BlockSpec((TR, LANES), lambda i: (i, 0)),     # lane-dense out
        ),
        compiler_params=pltpu.CompilerParams(dimension_semantics=("parallel",)),
        cost_estimate=cost,
    )(t_dense, pk)

    out_flat = out.reshape(-1)
    if B_pad != B:
        out_flat = out_flat[:B]
    return out_flat.reshape(B, 1)


def _stable_softplus(x):
    return jnp.maximum(x, 0.0) + jnp.log1p(jnp.exp(-jnp.abs(x)))


def init_params(key, hidden=32):
    """Deterministic parameter init. gamma-net weights made positive (monotone gamma)."""
    ks = jax.random.split(key, 8)
    w1_raw = jax.random.normal(ks[0], (1, hidden), jnp.float32) * 0.5
    w2_raw = jax.random.normal(ks[1], (1, hidden), jnp.float32) * 0.5
    return {
        "w1": _stable_softplus(w1_raw),                                   # (1, H) > 0
        "b1": jax.random.normal(ks[2], (1, hidden), jnp.float32) * 0.1,
        "w2": _stable_softplus(w2_raw),                                   # (1, H) > 0
        "b2": jax.random.normal(ks[3], (1, 1), jnp.float32) * 0.1,
        "v1": jax.random.normal(ks[4], (1, hidden), jnp.float32) * 0.5,
        "c1": jax.random.normal(ks[5], (1, hidden), jnp.float32) * 0.1,
        "v2": jax.random.normal(ks[6], (1, hidden), jnp.float32) * 0.5,
        "c2": jax.random.normal(ks[7], (1, 1), jnp.float32) * 0.1,
    }


def _reference(t, p):
    """Pure-JAX reference mirroring the PyTorch forward semantics."""
    h = jnp.tanh(t * p["w1"] + p["b1"])
    gamma = jnp.sum(h * p["w2"], axis=-1, keepdims=True) + p["b2"]
    d_gamma = jnp.sum((1.0 - h * h) * p["w1"] * p["w2"], axis=-1, keepdims=True)
    he = jnp.tanh(t * p["v1"] + p["c1"])
    eta = jax.nn.softplus(jnp.sum(he * p["v2"], axis=-1, keepdims=True) + p["c2"])
    sigma2 = jax.nn.sigmoid(gamma)
    return jnp.sqrt(sigma2 * d_gamma * eta)


if __name__ == "__main__":
    key = jax.random.PRNGKey(0)
    kp, kt = jax.random.split(key)
    B, H = 256, 32
    params = init_params(kp, hidden=H)
    t = jax.random.uniform(kt, (B, 1), jnp.float32, minval=0.0, maxval=1.0)

    out = gamma_volatility(t, params)
    out = jax.block_until_ready(out)

    ref = _reference(t, params)
    assert out.shape == (B, 1)
    assert jnp.allclose(out, ref, atol=1e-5, rtol=1e-5)
    print("KERNEL_OK")
</pallas_src>

<mosaic_0001>
module attributes {stable_mosaic.version = 11 : i64} {
  func.func @_gamma_volatility_kernel(%arg0: i32, %arg1: memref<2x128xf32, #tpu.memory_space<vmem>>, %arg2: memref<226xf32, #tpu.memory_space<smem>>, %arg3: memref<2x128xf32, #tpu.memory_space<vmem>>) attributes {dimension_semantics = [#tpu.dimension_semantics<parallel>], iteration_bounds = array<i64: 1>, scalar_prefetch = 0 : i64, scratch_operands = 0 : i64, tpu.core_type = #tpu.core_type<tc>, window_params = [{transform_indices = @transform_0, window_bounds = array<i64: 2, 128>}, {transform_indices = @transform_1, window_bounds = array<i64: 226>}, {transform_indices = @transform_2, window_bounds = array<i64: 2, 128>}]} {
    %c0 = arith.constant 0 : index
    %c0_0 = arith.constant 0 : index
    %0 = vector.load %arg1[%c0, %c0_0] : memref<2x128xf32, #tpu.memory_space<vmem>>, vector<2x128xf32>
    %cst = arith.constant 0.000000e+00 : f32
    %1 = vector.broadcast %cst : f32 to vector<2x128xf32>
    %cst_1 = arith.constant 0.000000e+00 : f32
    %2 = vector.broadcast %cst_1 : f32 to vector<2x128xf32>
    %cst_2 = arith.constant 0.000000e+00 : f32
    %3 = vector.broadcast %cst_2 : f32 to vector<2x128xf32>
    %c0_3 = arith.constant 0 : index
    %4 = memref.load %arg2[%c0_3] : memref<226xf32, #tpu.memory_space<smem>>
    %c32 = arith.constant 32 : index
    %5 = memref.load %arg2[%c32] : memref<226xf32, #tpu.memory_space<smem>>
    %c64 = arith.constant 64 : index
    %6 = memref.load %arg2[%c64] : memref<226xf32, #tpu.memory_space<smem>>
    %c96 = arith.constant 96 : index
    %7 = memref.load %arg2[%c96] : memref<226xf32, #tpu.memory_space<smem>>
    %c128 = arith.constant 128 : index
    %8 = memref.load %arg2[%c128] : memref<226xf32, #tpu.memory_space<smem>>
    %c160 = arith.constant 160 : index
    %9 = memref.load %arg2[%c160] : memref<226xf32, #tpu.memory_space<smem>>
    %c192 = arith.constant 192 : index
    %10 = memref.load %arg2[%c192] : memref<226xf32, #tpu.memory_space<smem>>
    %11 = vector.broadcast %4 : f32 to vector<2x128xf32>
    %12 = arith.mulf %11, %0 : vector<2x128xf32>
    %13 = vector.broadcast %5 : f32 to vector<2x128xf32>
    %14 = arith.addf %12, %13 : vector<2x128xf32>
    %15 = math.tanh %14 : vector<2x128xf32>
    %16 = vector.broadcast %8 : f32 to vector<2x128xf32>
    %17 = arith.mulf %16, %0 : vector<2x128xf32>
    %18 = vector.broadcast %9 : f32 to vector<2x128xf32>
    %19 = arith.addf %17, %18 : vector<2x128xf32>
    %20 = math.tanh %19 : vector<2x128xf32>
    %21 = vector.broadcast %6 : f32 to vector<2x128xf32>
    %22 = arith.mulf %21, %15 : vector<2x128xf32>
    %23 = arith.addf %1, %22 : vector<2x128xf32>
    %24 = arith.mulf %15, %15 : vector<2x128xf32>
    %cst_4 = arith.constant 1.000000e+00 : f32
    %25 = vector.broadcast %cst_4 : f32 to vector<2x128xf32>
    %26 = arith.subf %25, %24 : vector<2x128xf32>
    %27 = vector.broadcast %7 : f32 to vector<2x128xf32>
    %28 = arith.mulf %27, %26 : vector<2x128xf32>
    %29 = arith.addf %2, %28 : vector<2x128xf32>
    %30 = vector.broadcast %10 : f32 to vector<2x128xf32>
    %31 = arith.mulf %30, %20 : vector<2x128xf32>
    %32 = arith.addf %3, %31 : vector<2x128xf32>
    %c1 = arith.constant 1 : index
    %33 = memref.load %arg2[%c1] : memref<226xf32, #tpu.memory_space<smem>>
    %c33 = arith.constant 33 : index
    %34 = memref.load %arg2[%c33] : memref<226xf32, #tpu.memory_space<smem>>
    %c65 = arith.constant 65 : index
    %35 = memref.load %arg2[%c65] : memref<226xf32, #tpu.memory_space<smem>>
    %c97 = arith.constant 97 : index
    %36 = memref.load %arg2[%c97] : memref<226xf32, #tpu.memory_space<smem>>
    %c129 = arith.constant 129 : index
    %37 = memref.load %arg2[%c129] : memref<226xf32, #tpu.memory_space<smem>>
    %c161 = arith.constant 161 : index
    %38 = memref.load %arg2[%c161] : memref<226xf32, #tpu.memory_space<smem>>
    %c193 = arith.constant 193 : index
    %39 = memref.load %arg2[%c193] : memref<226xf32, #tpu.memory_space<smem>>
    %40 = vector.broadcast %33 : f32 to vector<2x128xf32>
    %41 = arith.mulf %40, %0 : vector<2x128xf32>
    %42 = vector.broadcast %34 : f32 to vector<2x128xf32>
    %43 = arith.addf %41, %42 : vector<2x128xf32>
    %44 = math.tanh %43 : vector<2x128xf32>
    %45 = vector.broadcast %37 : f32 to vector<2x128xf32>
    %46 = arith.mulf %45, %0 : vector<2x128xf32>
    %47 = vector.broadcast %38 : f32 to vector<2x128xf32>
    %48 = arith.addf %46, %47 : vector<2x128xf32>
    %49 = math.tanh %48 : vector<2x128xf32>
    %50 = vector.broadcast %35 : f32 to vector<2x128xf32>
    %51 = arith.mulf %50, %44 : vector<2x128xf32>
    %52 = arith.addf %23, %51 : vector<2x128xf32>
    %53 = arith.mulf %44, %44 : vector<2x128xf32>
    %cst_5 = arith.constant 1.000000e+00 : f32
    %54 = vector.broadcast %cst_5 : f32 to vector<2x128xf32>
    %55 = arith.subf %54, %53 : vector<2x128xf32>
    %56 = vector.broadcast %36 : f32 to vector<2x128xf32>
    %57 = arith.mulf %56, %55 : vector<2x128xf32>
    %58 = arith.addf %29, %57 : vector<2x128xf32>
    %59 = vector.broadcast %39 : f32 to vector<2x128xf32>
    %60 = arith.mulf %59, %49 : vector<2x128xf32>
    %61 = arith.addf %32, %60 : vector<2x128xf32>
    %c2 = arith.constant 2 : index
    %62 = memref.load %arg2[%c2] : memref<226xf32, #tpu.memory_space<smem>>
    %c34 = arith.constant 34 : index
    %63 = memref.load %arg2[%c34] : memref<226xf32, #tpu.memory_space<smem>>
    %c66 = arith.constant 66 : index
    %64 = memref.load %arg2[%c66] : memref<226xf32, #tpu.memory_space<smem>>
    %c98 = arith.constant 98 : index
    %65 = memref.load %arg2[%c98] : memref<226xf32, #tpu.memory_space<smem>>
    %c130 = arith.constant 130 : index
    %66 = memref.load %arg2[%c130] : memref<226xf32, #tpu.memory_space<smem>>
    %c162 = arith.constant 162 : index
    %67 = memref.load %arg2[%c162] : memref<226xf32, #tpu.memory_space<smem>>
    %c194 = arith.constant 194 : index
    %68 = memref.load %arg2[%c194] : memref<226xf32, #tpu.memory_space<smem>>
    %69 = vector.broadcast %62 : f32 to vector<2x128xf32>
    %70 = arith.mulf %69, %0 : vector<2x128xf32>
    %71 = vector.broadcast %63 : f32 to vector<2x128xf32>
    %72 = arith.addf %70, %71 : vector<2x128xf32>
    %73 = math.tanh %72 : vector<2x128xf32>
    %74 = vector.broadcast %66 : f32 to vector<2x128xf32>
    %75 = arith.mulf %74, %0 : vector<2x128xf32>
    %76 = vector.broadcast %67 : f32 to vector<2x128xf32>
    %77 = arith.addf %75, %76 : vector<2x128xf32>
    %78 = math.tanh %77 : vector<2x128xf32>
    %79 = vector.broadcast %64 : f32 to vector<2x128xf32>
    %80 = arith.mulf %79, %73 : vector<2x128xf32>
    %81 = arith.addf %52, %80 : vector<2x128xf32>
    %82 = arith.mulf %73, %73 : vector<2x128xf32>
    %cst_6 = arith.constant 1.000000e+00 : f32
    %83 = vector.broadcast %cst_6 : f32 to vector<2x128xf32>
    %84 = arith.subf %83, %82 : vector<2x128xf32>
    %85 = vector.broadcast %65 : f32 to vector<2x128xf32>
    %86 = arith.mulf %85, %84 : vector<2x128xf32>
    %87 = arith.addf %58, %86 : vector<2x128xf32>
    %88 = vector.broadcast %68 : f32 to vector<2x128xf32>
    %89 = arith.mulf %88, %78 : vector<2x128xf32>
    %90 = arith.addf %61, %89 : vector<2x128xf32>
    %c3 = arith.constant 3 : index
    %91 = memref.load %arg2[%c3] : memref<226xf32, #tpu.memory_space<smem>>
    %c35 = arith.constant 35 : index
    %92 = memref.load %arg2[%c35] : memref<226xf32, #tpu.memory_space<smem>>
    %c67 = arith.constant 67 : index
    %93 = memref.load %arg2[%c67] : memref<226xf32, #tpu.memory_space<smem>>
    %c99 = arith.constant 99 : index
    %94 = memref.load %arg2[%c99] : memref<226xf32, #tpu.memory_space<smem>>
    %c131 = arith.constant 131 : index
    %95 = memref.load %arg2[%c131] : memref<226xf32, #tpu.memory_space<smem>>
    %c163 = arith.constant 163 : index
    %96 = memref.load %arg2[%c163] : memref<226xf32, #tpu.memory_space<smem>>
    %c195 = arith.constant 195 : index
    %97 = memref.load %arg2[%c195] : memref<226xf32, #tpu.memory_space<smem>>
    %98 = vector.broadcast %91 : f32 to vector<2x128xf32>
    %99 = arith.mulf %98, %0 : vector<2x128xf32>
    %100 = vector.broadcast %92 : f32 to vector<2x128xf32>
    %101 = arith.addf %99, %100 : vector<2x128xf32>
    %102 = math.tanh %101 : vector<2x128xf32>
    %103 = vector.broadcast %95 : f32 to vector<2x128xf32>
    %104 = arith.mulf %103, %0 : vector<2x128xf32>
    %105 = vector.broadcast %96 : f32 to vector<2x128xf32>
    %106 = arith.addf %104, %105 : vector<2x128xf32>
    %107 = math.tanh %106 : vector<2x128xf32>
    %108 = vector.broadcast %93 : f32 to vector<2x128xf32>
    %109 = arith.mulf %108, %102 : vector<2x128xf32>
    %110 = arith.addf %81, %109 : vector<2x128xf32>
    %111 = arith.mulf %102, %102 : vector<2x128xf32>
    %cst_7 = arith.constant 1.000000e+00 : f32
    %112 = vector.broadcast %cst_7 : f32 to vector<2x128xf32>
    %113 = arith.subf %112, %111 : vector<2x128xf32>
    %114 = vector.broadcast %94 : f32 to vector<2x128xf32>
    %115 = arith.mulf %114, %113 : vector<2x128xf32>
    %116 = arith.addf %87, %115 : vector<2x128xf32>
    %117 = vector.broadcast %97 : f32 to vector<2x128xf32>
    %118 = arith.mulf %117, %107 : vector<2x128xf32>
    %119 = arith.addf %90, %118 : vector<2x128xf32>
    %c4 = arith.constant 4 : index
    %120 = memref.load %arg2[%c4] : memref<226xf32, #tpu.memory_space<smem>>
    %c36 = arith.constant 36 : index
    %121 = memref.load %arg2[%c36] : memref<226xf32, #tpu.memory_space<smem>>
    %c68 = arith.constant 68 : index
    %122 = memref.load %arg2[%c68] : memref<226xf32, #tpu.memory_space<smem>>
    %c100 = arith.constant 100 : index
    %123 = memref.load %arg2[%c100] : memref<226xf32, #tpu.memory_space<smem>>
    %c132 = arith.constant 132 : index
    %124 = memref.load %arg2[%c132] : memref<226xf32, #tpu.memory_space<smem>>
    %c164 = arith.constant 164 : index
    %125 = memref.load %arg2[%c164] : memref<226xf32, #tpu.memory_space<smem>>
    %c196 = arith.constant 196 : index
    %126 = memref.load %arg2[%c196] : memref<226xf32, #tpu.memory_space<smem>>
    %127 = vector.broadcast %120 : f32 to vector<2x128xf32>
    %128 = arith.mulf %127, %0 : vector<2x128xf32>
    %129 = vector.broadcast %121 : f32 to vector<2x128xf32>
    %130 = arith.addf %128, %129 : vector<2x128xf32>
    %131 = math.tanh %130 : vector<2x128xf32>
    %132 = vector.broadcast %124 : f32 to vector<2x128xf32>
    %133 = arith.mulf %132, %0 : vector<2x128xf32>
    %134 = vector.broadcast %125 : f32 to vector<2x128xf32>
    %135 = arith.addf %133, %134 : vector<2x128xf32>
    %136 = math.tanh %135 : vector<2x128xf32>
    %137 = vector.broadcast %122 : f32 to vector<2x128xf32>
    %138 = arith.mulf %137, %131 : vector<2x128xf32>
    %139 = arith.addf %110, %138 : vector<2x128xf32>
    %140 = arith.mulf %131, %131 : vector<2x128xf32>
    %cst_8 = arith.constant 1.000000e+00 : f32
    %141 = vector.broadcast %cst_8 : f32 to vector<2x128xf32>
    %142 = arith.subf %141, %140 : vector<2x128xf32>
    %143 = vector.broadcast %123 : f32 to vector<2x128xf32>
    %144 = arith.mulf %143, %142 : vector<2x128xf32>
    %145 = arith.addf %116, %144 : vector<2x128xf32>
    %146 = vector.broadcast %126 : f32 to vector<2x128xf32>
    %147 = arith.mulf %146, %136 : vector<2x128xf32>
    %148 = arith.addf %119, %147 : vector<2x128xf32>
    %c5 = arith.constant 5 : index
    %149 = memref.load %arg2[%c5] : memref<226xf32, #tpu.memory_space<smem>>
    %c37 = arith.constant 37 : index
    %150 = memref.load %arg2[%c37] : memref<226xf32, #tpu.memory_space<smem>>
    %c69 = arith.constant 69 : index
    %151 = memref.load %arg2[%c69] : memref<226xf32, #tpu.memory_space<smem>>
    %c101 = arith.constant 101 : index
    %152 = memref.load %arg2[%c101] : memref<226xf32, #tpu.memory_space<smem>>
    %c133 = arith.constant 133 : index
    %153 = memref.load %arg2[%c133] : memref<226xf32, #tpu.memory_space<smem>>
    %c165 = arith.constant 165 : index
    %154 = memref.load %arg2[%c165] : memref<226xf32, #tpu.memory_space<smem>>
    %c197 = arith.constant 197 : index
    %155 = memref.load %arg2[%c197] : memref<226xf32, #tpu.memory_space<smem>>
    %156 = vector.broadcast %149 : f32 to vector<2x128xf32>
    %157 = arith.mulf %156, %0 : vector<2x128xf32>
    %158 = vector.broadcast %150 : f32 to vector<2x128xf32>
    %159 = arith.addf %157, %158 : vector<2x128xf32>
    %160 = math.tanh %159 : vector<2x128xf32>
    %161 = vector.broadcast %153 : f32 to vector<2x128xf32>
    %162 = arith.mulf %161, %0 : vector<2x128xf32>
    %163 = vector.broadcast %154 : f32 to vector<2x128xf32>
    %164 = arith.addf %162, %163 : vector<2x128xf32>
    %165 = math.tanh %164 : vector<2x128xf32>
    %166 = vector.broadcast %151 : f32 to vector<2x128xf32>
    %167 = arith.mulf %166, %160 : vector<2x128xf32>
    %168 = arith.addf %139, %167 : vector<2x128xf32>
    %169 = arith.mulf %160, %160 : vector<2x128xf32>
    %cst_9 = arith.constant 1.000000e+00 : f32
    %170 = vector.broadcast %cst_9 : f32 to vector<2x128xf32>
    %171 = arith.subf %170, %169 : vector<2x128xf32>
    %172 = vector.broadcast %152 : f32 to vector<2x128xf32>
    %173 = arith.mulf %172, %171 : vector<2x128xf32>
    %174 = arith.addf %145, %173 : vector<2x128xf32>
    %175 = vector.broadcast %155 : f32 to vector<2x128xf32>
    %176 = arith.mulf %175, %165 : vector<2x128xf32>
    %177 = arith.addf %148, %176 : vector<2x128xf32>
    %c6 = arith.constant 6 : index
    %178 = memref.load %arg2[%c6] : memref<226xf32, #tpu.memory_space<smem>>
    %c38 = arith.constant 38 : index
    %179 = memref.load %arg2[%c38] : memref<226xf32, #tpu.memory_space<smem>>
    %c70 = arith.constant 70 : index
    %180 = memref.load %arg2[%c70] : memref<226xf32, #tpu.memory_space<smem>>
    %c102 = arith.constant 102 : index
    %181 = memref.load %arg2[%c102] : memref<226xf32, #tpu.memory_space<smem>>
    %c134 = arith.constant 134 : index
    %182 = memref.load %arg2[%c134] : memref<226xf32, #tpu.memory_space<smem>>
    %c166 = arith.constant 166 : index
    %183 = memref.load %arg2[%c166] : memref<226xf32, #tpu.memory_space<smem>>
    %c198 = arith.constant 198 : index
    %184 = memref.load %arg2[%c198] : memref<226xf32, #tpu.memory_space<smem>>
    %185 = vector.broadcast %178 : f32 to vector<2x128xf32>
    %186 = arith.mulf %185, %0 : vector<2x128xf32>
    %187 = vector.broadcast %179 : f32 to vector<2x128xf32>
    %188 = arith.addf %186, %187 : vector<2x128xf32>
    %189 = math.tanh %188 : vector<2x128xf32>
    %190 = vector.broadcast %182 : f32 to vector<2x128xf32>
    %191 = arith.mulf %190, %0 : vector<2x128xf32>
    %192 = vector.broadcast %183 : f32 to vector<2x128xf32>
    %193 = arith.addf %191, %192 : vector<2x128xf32>
    %194 = math.tanh %193 : vector<2x128xf32>
    %195 = vector.broadcast %180 : f32 to vector<2x128xf32>
    %196 = arith.mulf %195, %189 : vector<2x128xf32>
    %197 = arith.addf %168, %196 : vector<2x128xf32>
    %198 = arith.mulf %189, %189 : vector<2x128xf32>
    %cst_10 = arith.constant 1.000000e+00 : f32
    %199 = vector.broadcast %cst_10 : f32 to vector<2x128xf32>
    %200 = arith.subf %199, %198 : vector<2x128xf32>
    %201 = vector.broadcast %181 : f32 to vector<2x128xf32>
    %202 = arith.mulf %201, %200 : vector<2x128xf32>
    %203 = arith.addf %174, %202 : vector<2x128xf32>
    %204 = vector.broadcast %184 : f32 to vector<2x128xf32>
    %205 = arith.mulf %204, %194 : vector<2x128xf32>
    %206 = arith.addf %177, %205 : vector<2x128xf32>
    %c7 = arith.constant 7 : index
    %207 = memref.load %arg2[%c7] : memref<226xf32, #tpu.memory_space<smem>>
    %c39 = arith.constant 39 : index
    %208 = memref.load %arg2[%c39] : memref<226xf32, #tpu.memory_space<smem>>
    %c71 = arith.constant 71 : index
    %209 = memref.load %arg2[%c71] : memref<226xf32, #tpu.memory_space<smem>>
    %c103 = arith.constant 103 : index
    %210 = memref.load %arg2[%c103] : memref<226xf32, #tpu.memory_space<smem>>
    %c135 = arith.constant 135 : index
    %211 = memref.load %arg2[%c135] : memref<226xf32, #tpu.memory_space<smem>>
    %c167 = arith.constant 167 : index
    %212 = memref.load %arg2[%c167] : memref<226xf32, #tpu.memory_space<smem>>
    %c199 = arith.constant 199 : index
    %213 = memref.load %arg2[%c199] : memref<226xf32, #tpu.memory_space<smem>>
    %214 = vector.broadcast %207 : f32 to vector<2x128xf32>
    %215 = arith.mulf %214, %0 : vector<2x128xf32>
    %216 = vector.broadcast %208 : f32 to vector<2x128xf32>
    %217 = arith.addf %215, %216 : vector<2x128xf32>
    %218 = math.tanh %217 : vector<2x128xf32>
    %219 = vector.broadcast %211 : f32 to vector<2x128xf32>
    %220 = arith.mulf %219, %0 : vector<2x128xf32>
    %221 = vector.broadcast %212 : f32 to vector<2x128xf32>
    %222 = arith.addf %220, %221 : vector<2x128xf32>
    %223 = math.tanh %222 : vector<2x128xf32>
    %224 = vector.broadcast %209 : f32 to vector<2x128xf32>
    %225 = arith.mulf %224, %218 : vector<2x128xf32>
    %226 = arith.addf %197, %225 : vector<2x128xf32>
    %227 = arith.mulf %218, %218 : vector<2x128xf32>
    %cst_11 = arith.constant 1.000000e+00 : f32
    %228 = vector.broadcast %cst_11 : f32 to vector<2x128xf32>
    %229 = arith.subf %228, %227 : vector<2x128xf32>
    %230 = vector.broadcast %210 : f32 to vector<2x128xf32>
    %231 = arith.mulf %230, %229 : vector<2x128xf32>
    %232 = arith.addf %203, %231 : vector<2x128xf32>
    %233 = vector.broadcast %213 : f32 to vector<2x128xf32>
    %234 = arith.mulf %233, %223 : vector<2x128xf32>
    %235 = arith.addf %206, %234 : vector<2x128xf32>
    %c8 = arith.constant 8 : index
    %236 = memref.load %arg2[%c8] : memref<226xf32, #tpu.memory_space<smem>>
    %c40 = arith.constant 40 : index
    %237 = memref.load %arg2[%c40] : memref<226xf32, #tpu.memory_space<smem>>
    %c72 = arith.constant 72 : index
    %238 = memref.load %arg2[%c72] : memref<226xf32, #tpu.memory_space<smem>>
    %c104 = arith.constant 104 : index
    %239 = memref.load %arg2[%c104] : memref<226xf32, #tpu.memory_space<smem>>
    %c136 = arith.constant 136 : index
    %240 = memref.load %arg2[%c136] : memref<226xf32, #tpu.memory_space<smem>>
    %c168 = arith.constant 168 : index
    %241 = memref.load %arg2[%c168] : memref<226xf32, #tpu.memory_space<smem>>
    %c200 = arith.constant 200 : index
    %242 = memref.load %arg2[%c200] : memref<226xf32, #tpu.memory_space<smem>>
    %243 = vector.broadcast %236 : f32 to vector<2x128xf32>
    %244 = arith.mulf %243, %0 : vector<2x128xf32>
    %245 = vector.broadcast %237 : f32 to vector<2x128xf32>
    %246 = arith.addf %244, %245 : vector<2x128xf32>
    %247 = math.tanh %246 : vector<2x128xf32>
    %248 = vector.broadcast %240 : f32 to vector<2x128xf32>
    %249 = arith.mulf %248, %0 : vector<2x128xf32>
    %250 = vector.broadcast %241 : f32 to vector<2x128xf32>
    %251 = arith.addf %249, %250 : vector<2x128xf32>
    %252 = math.tanh %251 : vector<2x128xf32>
    %253 = vector.broadcast %238 : f32 to vector<2x128xf32>
    %254 = arith.mulf %253, %247 : vector<2x128xf32>
    %255 = arith.addf %226, %254 : vector<2x128xf32>
    %256 = arith.mulf %247, %247 : vector<2x128xf32>
    %cst_12 = arith.constant 1.000000e+00 : f32
    %257 = vector.broadcast %cst_12 : f32 to vector<2x128xf32>
    %258 = arith.subf %257, %256 : vector<2x128xf32>
    %259 = vector.broadcast %239 : f32 to vector<2x128xf32>
    %260 = arith.mulf %259, %258 : vector<2x128xf32>
    %261 = arith.addf %232, %260 : vector<2x128xf32>
    %262 = vector.broadcast %242 : f32 to vector<2x128xf32>
    %263 = arith.mulf %262, %252 : vector<2x128xf32>
    %264 = arith.addf %235, %263 : vector<2x128xf32>
    %c9 = arith.constant 9 : index
    %265 = memref.load %arg2[%c9] : memref<226xf32, #tpu.memory_space<smem>>
    %c41 = arith.constant 41 : index
    %266 = memref.load %arg2[%c41] : memref<226xf32, #tpu.memory_space<smem>>
    %c73 = arith.constant 73 : index
    %267 = memref.load %arg2[%c73] : memref<226xf32, #tpu.memory_space<smem>>
    %c105 = arith.constant 105 : index
    %268 = memref.load %arg2[%c105] : memref<226xf32, #tpu.memory_space<smem>>
    %c137 = arith.constant 137 : index
    %269 = memref.load %arg2[%c137] : memref<226xf32, #tpu.memory_space<smem>>
    %c169 = arith.constant 169 : index
    %270 = memref.load %arg2[%c169] : memref<226xf32, #tpu.memory_space<smem>>
    %c201 = arith.constant 201 : index
    %271 = memref.load %arg2[%c201] : memref<226xf32, #tpu.memory_space<smem>>
    %272 = vector.broadcast %265 : f32 to vector<2x128xf32>
    %273 = arith.mulf %272, %0 : vector<2x128xf32>
    %274 = vector.broadcast %266 : f32 to vector<2x128xf32>
    %275 = arith.addf %273, %274 : vector<2x128xf32>
    %276 = math.tanh %275 : vector<2x128xf32>
    %277 = vector.broadcast %269 : f32 to vector<2x128xf32>
    %278 = arith.mulf %277, %0 : vector<2x128xf32>
    %279 = vector.broadcast %270 : f32 to vector<2x128xf32>
    %280 = arith.addf %278, %279 : vector<2x128xf32>
    %281 = math.tanh %280 : vector<2x128xf32>
    %282 = vector.broadcast %267 : f32 to vector<2x128xf32>
    %283 = arith.mulf %282, %276 : vector<2x128xf32>
    %284 = arith.addf %255, %283 : vector<2x128xf32>
    %285 = arith.mulf %276, %276 : vector<2x128xf32>
    %cst_13 = arith.constant 1.000000e+00 : f32
    %286 = vector.broadcast %cst_13 : f32 to vector<2x128xf32>
    %287 = arith.subf %286, %285 : vector<2x128xf32>
    %288 = vector.broadcast %268 : f32 to vector<2x128xf32>
    %289 = arith.mulf %288, %287 : vector<2x128xf32>
    %290 = arith.addf %261, %289 : vector<2x128xf32>
    %291 = vector.broadcast %271 : f32 to vector<2x128xf32>
    %292 = arith.mulf %291, %281 : vector<2x128xf32>
    %293 = arith.addf %264, %292 : vector<2x128xf32>
    %c10 = arith.constant 10 : index
    %294 = memref.load %arg2[%c10] : memref<226xf32, #tpu.memory_space<smem>>
    %c42 = arith.constant 42 : index
    %295 = memref.load %arg2[%c42] : memref<226xf32, #tpu.memory_space<smem>>
    %c74 = arith.constant 74 : index
    %296 = memref.load %arg2[%c74] : memref<226xf32, #tpu.memory_space<smem>>
    %c106 = arith.constant 106 : index
    %297 = memref.load %arg2[%c106] : memref<226xf32, #tpu.memory_space<smem>>
    %c138 = arith.constant 138 : index
    %298 = memref.load %arg2[%c138] : memref<226xf32, #tpu.memory_space<smem>>
    %c170 = arith.constant 170 : index
    %299 = memref.load %arg2[%c170] : memref<226xf32, #tpu.memory_space<smem>>
    %c202 = arith.constant 202 : index
    %300 = memref.load %arg2[%c202] : memref<226xf32, #tpu.memory_space<smem>>
    %301 = vector.broadcast %294 : f32 to vector<2x128xf32>
    %302 = arith.mulf %301, %0 : vector<2x128xf32>
    %303 = vector.broadcast %295 : f32 to vector<2x128xf32>
    %304 = arith.addf %302, %303 : vector<2x128xf32>
    %305 = math.tanh %304 : vector<2x128xf32>
    %306 = vector.broadcast %298 : f32 to vector<2x128xf32>
    %307 = arith.mulf %306, %0 : vector<2x128xf32>
    %308 = vector.broadcast %299 : f32 to vector<2x128xf32>
    %309 = arith.addf %307, %308 : vector<2x128xf32>
    %310 = math.tanh %309 : vector<2x128xf32>
    %311 = vector.broadcast %296 : f32 to vector<2x128xf32>
    %312 = arith.mulf %311, %305 : vector<2x128xf32>
    %313 = arith.addf %284, %312 : vector<2x128xf32>
    %314 = arith.mulf %305, %305 : vector<2x128xf32>
    %cst_14 = arith.constant 1.000000e+00 : f32
    %315 = vector.broadcast %cst_14 : f32 to vector<2x128xf32>
    %316 = arith.subf %315, %314 : vector<2x128xf32>
    %317 = vector.broadcast %297 : f32 to vector<2x128xf32>
    %318 = arith.mulf %317, %316 : vector<2x128xf32>
    %319 = arith.addf %290, %318 : vector<2x128xf32>
    %320 = vector.broadcast %300 : f32 to vector<2x128xf32>
    %321 = arith.mulf %320, %310 : vector<2x128xf32>
    %322 = arith.addf %293, %321 : vector<2x128xf32>
    %c11 = arith.constant 11 : index
    %323 = memref.load %arg2[%c11] : memref<226xf32, #tpu.memory_space<smem>>
    %c43 = arith.constant 43 : index
    %324 = memref.load %arg2[%c43] : memref<226xf32, #tpu.memory_space<smem>>
    %c75 = arith.constant 75 : index
    %325 = memref.load %arg2[%c75] : memref<226xf32, #tpu.memory_space<smem>>
    %c107 = arith.constant 107 : index
    %326 = memref.load %arg2[%c107] : memref<226xf32, #tpu.memory_space<smem>>
    %c139 = arith.constant 139 : index
    %327 = memref.load %arg2[%c139] : memref<226xf32, #tpu.memory_space<smem>>
    %c171 = arith.constant 171 : index
    %328 = memref.load %arg2[%c171] : memref<226xf32, #tpu.memory_space<smem>>
    %c203 = arith.constant 203 : index
    %329 = memref.load %arg2[%c203] : memref<226xf32, #tpu.memory_space<smem>>
    %330 = vector.broadcast %323 : f32 to vector<2x128xf32>
    %331 = arith.mulf %330, %0 : vector<2x128xf32>
    %332 = vector.broadcast %324 : f32 to vector<2x128xf32>
    %333 = arith.addf %331, %332 : vector<2x128xf32>
    %334 = math.tanh %333 : vector<2x128xf32>
    %335 = vector.broadcast %327 : f32 to vector<2x128xf32>
    %336 = arith.mulf %335, %0 : vector<2x128xf32>
    %337 = vector.broadcast %328 : f32 to vector<2x128xf32>
    %338 = arith.addf %336, %337 : vector<2x128xf32>
    %339 = math.tanh %338 : vector<2x128xf32>
    %340 = vector.broadcast %325 : f32 to vector<2x128xf32>
    %341 = arith.mulf %340, %334 : vector<2x128xf32>
    %342 = arith.addf %313, %341 : vector<2x128xf32>
    %343 = arith.mulf %334, %334 : vector<2x128xf32>
    %cst_15 = arith.constant 1.000000e+00 : f32
    %344 = vector.broadcast %cst_15 : f32 to vector<2x128xf32>
    %345 = arith.subf %344, %343 : vector<2x128xf32>
    %346 = vector.broadcast %326 : f32 to vector<2x128xf32>
    %347 = arith.mulf %346, %345 : vector<2x128xf32>
    %348 = arith.addf %319, %347 : vector<2x128xf32>
    %349 = vector.broadcast %329 : f32 to vector<2x128xf32>
    %350 = arith.mulf %349, %339 : vector<2x128xf32>
    %351 = arith.addf %322, %350 : vector<2x128xf32>
    %c12 = arith.constant 12 : index
    %352 = memref.load %arg2[%c12] : memref<226xf32, #tpu.memory_space<smem>>
    %c44 = arith.constant 44 : index
    %353 = memref.load %arg2[%c44] : memref<226xf32, #tpu.memory_space<smem>>
    %c76 = arith.constant 76 : index
    %354 = memref.load %arg2[%c76] : memref<226xf32, #tpu.memory_space<smem>>
    %c108 = arith.constant 108 : index
    %355 = memref.load %arg2[%c108] : memref<226xf32, #tpu.memory_space<smem>>
    %c140 = arith.constant 140 : index
    %356 = memref.load %arg2[%c140] : memref<226xf32, #tpu.memory_space<smem>>
    %c172 = arith.constant 172 : index
    %357 = memref.load %arg2[%c172] : memref<226xf32, #tpu.memory_space<smem>>
    %c204 = arith.constant 204 : index
    %358 = memref.load %arg2[%c204] : memref<226xf32, #tpu.memory_space<smem>>
    %359 = vector.broadcast %352 : f32 to vector<2x128xf32>
    %360 = arith.mulf %359, %0 : vector<2x128xf32>
    %361 = vector.broadcast %353 : f32 to vector<2x128xf32>
    %362 = arith.addf %360, %361 : vector<2x128xf32>
    %363 = math.tanh %362 : vector<2x128xf32>
    %364 = vector.broadcast %356 : f32 to vector<2x128xf32>
    %365 = arith.mulf %364, %0 : vector<2x128xf32>
    %366 = vector.broadcast %357 : f32 to vector<2x128xf32>
    %367 = arith.addf %365, %366 : vector<2x128xf32>
    %368 = math.tanh %367 : vector<2x128xf32>
    %369 = vector.broadcast %354 : f32 to vector<2x128xf32>
    %370 = arith.mulf %369, %363 : vector<2x128xf32>
    %371 = arith.addf %342, %370 : vector<2x128xf32>
    %372 = arith.mulf %363, %363 : vector<2x128xf32>
    %cst_16 = arith.constant 1.000000e+00 : f32
    %373 = vector.broadcast %cst_16 : f32 to vector<2x128xf32>
    %374 = arith.subf %373, %372 : vector<2x128xf32>
    %375 = vector.broadcast %355 : f32 to vector<2x128xf32>
    %376 = arith.mulf %375, %374 : vector<2x128xf32>
    %377 = arith.addf %348, %376 : vector<2x128xf32>
    %378 = vector.broadcast %358 : f32 to vector<2x128xf32>
    %379 = arith.mulf %378, %368 : vector<2x128xf32>
    %380 = arith.addf %351, %379 : vector<2x128xf32>
    %c13 = arith.constant 13 : index
    %381 = memref.load %arg2[%c13] : memref<226xf32, #tpu.memory_space<smem>>
    %c45 = arith.constant 45 : index
    %382 = memref.load %arg2[%c45] : memref<226xf32, #tpu.memory_space<smem>>
    %c77 = arith.constant 77 : index
    %383 = memref.load %arg2[%c77] : memref<226xf32, #tpu.memory_space<smem>>
    %c109 = arith.constant 109 : index
    %384 = memref.load %arg2[%c109] : memref<226xf32, #tpu.memory_space<smem>>
    %c141 = arith.constant 141 : index
    %385 = memref.load %arg2[%c141] : memref<226xf32, #tpu.memory_space<smem>>
    %c173 = arith.constant 173 : index
    %386 = memref.load %arg2[%c173] : memref<226xf32, #tpu.memory_space<smem>>
    %c205 = arith.constant 205 : index
    %387 = memref.load %arg2[%c205] : memref<226xf32, #tpu.memory_space<smem>>
    %388 = vector.broadcast %381 : f32 to vector<2x128xf32>
    %389 = arith.mulf %388, %0 : vector<2x128xf32>
    %390 = vector.broadcast %382 : f32 to vector<2x128xf32>
    %391 = arith.addf %389, %390 : vector<2x128xf32>
    %392 = math.tanh %391 : vector<2x128xf32>
    %393 = vector.broadcast %385 : f32 to vector<2x128xf32>
    %394 = arith.mulf %393, %0 : vector<2x128xf32>
    %395 = vector.broadcast %386 : f32 to vector<2x128xf32>
    %396 = arith.addf %394, %395 : vector<2x128xf32>
    %397 = math.tanh %396 : vector<2x128xf32>
    %398 = vector.broadcast %383 : f32 to vector<2x128xf32>
    %399 = arith.mulf %398, %392 : vector<2x128xf32>
    %400 = arith.addf %371, %399 : vector<2x128xf32>
    %401 = arith.mulf %392, %392 : vector<2x128xf32>
    %cst_17 = arith.constant 1.000000e+00 : f32
    %402 = vector.broadcast %cst_17 : f32 to vector<2x128xf32>
    %403 = arith.subf %402, %401 : vector<2x128xf32>
    %404 = vector.broadcast %384 : f32 to vector<2x128xf32>
    %405 = arith.mulf %404, %403 : vector<2x128xf32>
    %406 = arith.addf %377, %405 : vector<2x128xf32>
    %407 = vector.broadcast %387 : f32 to vector<2x128xf32>
    %408 = arith.mulf %407, %397 : vector<2x128xf32>
    %409 = arith.addf %380, %408 : vector<2x128xf32>
    %c14 = arith.constant 14 : index
    %410 = memref.load %arg2[%c14] : memref<226xf32, #tpu.memory_space<smem>>
    %c46 = arith.constant 46 : index
    %411 = memref.load %arg2[%c46] : memref<226xf32, #tpu.memory_space<smem>>
    %c78 = arith.constant 78 : index
    %412 = memref.load %arg2[%c78] : memref<226xf32, #tpu.memory_space<smem>>
    %c110 = arith.constant 110 : index
    %413 = memref.load %arg2[%c110] : memref<226xf32, #tpu.memory_space<smem>>
    %c142 = arith.constant 142 : index
    %414 = memref.load %arg2[%c142] : memref<226xf32, #tpu.memory_space<smem>>
    %c174 = arith.constant 174 : index
    %415 = memref.load %arg2[%c174] : memref<226xf32, #tpu.memory_space<smem>>
    %c206 = arith.constant 206 : index
    %416 = memref.load %arg2[%c206] : memref<226xf32, #tpu.memory_space<smem>>
    %417 = vector.broadcast %410 : f32 to vector<2x128xf32>
    %418 = arith.mulf %417, %0 : vector<2x128xf32>
    %419 = vector.broadcast %411 : f32 to vector<2x128xf32>
    %420 = arith.addf %418, %419 : vector<2x128xf32>
    %421 = math.tanh %420 : vector<2x128xf32>
    %422 = vector.broadcast %414 : f32 to vector<2x128xf32>
    %423 = arith.mulf %422, %0 : vector<2x128xf32>
    %424 = vector.broadcast %415 : f32 to vector<2x128xf32>
    %425 = arith.addf %423, %424 : vector<2x128xf32>
    %426 = math.tanh %425 : vector<2x128xf32>
    %427 = vector.broadcast %412 : f32 to vector<2x128xf32>
    %428 = arith.mulf %427, %421 : vector<2x128xf32>
    %429 = arith.addf %400, %428 : vector<2x128xf32>
    %430 = arith.mulf %421, %421 : vector<2x128xf32>
    %cst_18 = arith.constant 1.000000e+00 : f32
    %431 = vector.broadcast %cst_18 : f32 to vector<2x128xf32>
    %432 = arith.subf %431, %430 : vector<2x128xf32>
    %433 = vector.broadcast %413 : f32 to vector<2x128xf32>
    %434 = arith.mulf %433, %432 : vector<2x128xf32>
    %435 = arith.addf %406, %434 : vector<2x128xf32>
    %436 = vector.broadcast %416 : f32 to vector<2x128xf32>
    %437 = arith.mulf %436, %426 : vector<2x128xf32>
    %438 = arith.addf %409, %437 : vector<2x128xf32>
    %c15 = arith.constant 15 : index
    %439 = memref.load %arg2[%c15] : memref<226xf32, #tpu.memory_space<smem>>
    %c47 = arith.constant 47 : index
    %440 = memref.load %arg2[%c47] : memref<226xf32, #tpu.memory_space<smem>>
    %c79 = arith.constant 79 : index
    %441 = memref.load %arg2[%c79] : memref<226xf32, #tpu.memory_space<smem>>
    %c111 = arith.constant 111 : index
    %442 = memref.load %arg2[%c111] : memref<226xf32, #tpu.memory_space<smem>>
    %c143 = arith.constant 143 : index
    %443 = memref.load %arg2[%c143] : memref<226xf32, #tpu.memory_space<smem>>
    %c175 = arith.constant 175 : index
    %444 = memref.load %arg2[%c175] : memref<226xf32, #tpu.memory_space<smem>>
    %c207 = arith.constant 207 : index
    %445 = memref.load %arg2[%c207] : memref<226xf32, #tpu.memory_space<smem>>
    %446 = vector.broadcast %439 : f32 to vector<2x128xf32>
    %447 = arith.mulf %446, %0 : vector<2x128xf32>
    %448 = vector.broadcast %440 : f32 to vector<2x128xf32>
    %449 = arith.addf %447, %448 : vector<2x128xf32>
    %450 = math.tanh %449 : vector<2x128xf32>
    %451 = vector.broadcast %443 : f32 to vector<2x128xf32>
    %452 = arith.mulf %451, %0 : vector<2x128xf32>
    %453 = vector.broadcast %444 : f32 to vector<2x128xf32>
    %454 = arith.addf %452, %453 : vector<2x128xf32>
    %455 = math.tanh %454 : vector<2x128xf32>
    %456 = vector.broadcast %441 : f32 to vector<2x128xf32>
    %457 = arith.mulf %456, %450 : vector<2x128xf32>
    %458 = arith.addf %429, %457 : vector<2x128xf32>
    %459 = arith.mulf %450, %450 : vector<2x128xf32>
    %cst_19 = arith.constant 1.000000e+00 : f32
    %460 = vector.broadcast %cst_19 : f32 to vector<2x128xf32>
    %461 = arith.subf %460, %459 : vector<2x128xf32>
    %462 = vector.broadcast %442 : f32 to vector<2x128xf32>
    %463 = arith.mulf %462, %461 : vector<2x128xf32>
    %464 = arith.addf %435, %463 : vector<2x128xf32>
    %465 = vector.broadcast %445 : f32 to vector<2x128xf32>
    %466 = arith.mulf %465, %455 : vector<2x128xf32>
    %467 = arith.addf %438, %466 : vector<2x128xf32>
    %c16 = arith.constant 16 : index
    %468 = memref.load %arg2[%c16] : memref<226xf32, #tpu.memory_space<smem>>
    %c48 = arith.constant 48 : index
    %469 = memref.load %arg2[%c48] : memref<226xf32, #tpu.memory_space<smem>>
    %c80 = arith.constant 80 : index
    %470 = memref.load %arg2[%c80] : memref<226xf32, #tpu.memory_space<smem>>
    %c112 = arith.constant 112 : index
    %471 = memref.load %arg2[%c112] : memref<226xf32, #tpu.memory_space<smem>>
    %c144 = arith.constant 144 : index
    %472 = memref.load %arg2[%c144] : memref<226xf32, #tpu.memory_space<smem>>
    %c176 = arith.constant 176 : index
    %473 = memref.load %arg2[%c176] : memref<226xf32, #tpu.memory_space<smem>>
    %c208 = arith.constant 208 : index
    %474 = memref.load %arg2[%c208] : memref<226xf32, #tpu.memory_space<smem>>
    %475 = vector.broadcast %468 : f32 to vector<2x128xf32>
    %476 = arith.mulf %475, %0 : vector<2x128xf32>
    %477 = vector.broadcast %469 : f32 to vector<2x128xf32>
    %478 = arith.addf %476, %477 : vector<2x128xf32>
    %479 = math.tanh %478 : vector<2x128xf32>
    %480 = vector.broadcast %472 : f32 to vector<2x128xf32>
    %481 = arith.mulf %480, %0 : vector<2x128xf32>
    %482 = vector.broadcast %473 : f32 to vector<2x128xf32>
    %483 = arith.addf %481, %482 : vector<2x128xf32>
    %484 = math.tanh %483 : vector<2x128xf32>
    %485 = vector.broadcast %470 : f32 to vector<2x128xf32>
    %486 = arith.mulf %485, %479 : vector<2x128xf32>
    %487 = arith.addf %458, %486 : vector<2x128xf32>
    %488 = arith.mulf %479, %479 : vector<2x128xf32>
    %cst_20 = arith.constant 1.000000e+00 : f32
    %489 = vector.broadcast %cst_20 : f32 to vector<2x128xf32>
    %490 = arith.subf %489, %488 : vector<2x128xf32>
    %491 = vector.broadcast %471 : f32 to vector<2x128xf32>
    %492 = arith.mulf %491, %490 : vector<2x128xf32>
    %493 = arith.addf %464, %492 : vector<2x128xf32>
    %494 = vector.broadcast %474 : f32 to vector<2x128xf32>
    %495 = arith.mulf %494, %484 : vector<2x128xf32>
    %496 = arith.addf %467, %495 : vector<2x128xf32>
    %c17 = arith.constant 17 : index
    %497 = memref.load %arg2[%c17] : memref<226xf32, #tpu.memory_space<smem>>
    %c49 = arith.constant 49 : index
    %498 = memref.load %arg2[%c49] : memref<226xf32, #tpu.memory_space<smem>>
    %c81 = arith.constant 81 : index
    %499 = memref.load %arg2[%c81] : memref<226xf32, #tpu.memory_space<smem>>
    %c113 = arith.constant 113 : index
    %500 = memref.load %arg2[%c113] : memref<226xf32, #tpu.memory_space<smem>>
    %c145 = arith.constant 145 : index
    %501 = memref.load %arg2[%c145] : memref<226xf32, #tpu.memory_space<smem>>
    %c177 = arith.constant 177 : index
    %502 = memref.load %arg2[%c177] : memref<226xf32, #tpu.memory_space<smem>>
    %c209 = arith.constant 209 : index
    %503 = memref.load %arg2[%c209] : memref<226xf32, #tpu.memory_space<smem>>
    %504 = vector.broadcast %497 : f32 to vector<2x128xf32>
    %505 = arith.mulf %504, %0 : vector<2x128xf32>
    %506 = vector.broadcast %498 : f32 to vector<2x128xf32>
    %507 = arith.addf %505, %506 : vector<2x128xf32>
    %508 = math.tanh %507 : vector<2x128xf32>
    %509 = vector.broadcast %501 : f32 to vector<2x128xf32>
    %510 = arith.mulf %509, %0 : vector<2x128xf32>
    %511 = vector.broadcast %502 : f32 to vector<2x128xf32>
    %512 = arith.addf %510, %511 : vector<2x128xf32>
    %513 = math.tanh %512 : vector<2x128xf32>
    %514 = vector.broadcast %499 : f32 to vector<2x128xf32>
    %515 = arith.mulf %514, %508 : vector<2x128xf32>
    %516 = arith.addf %487, %515 : vector<2x128xf32>
    %517 = arith.mulf %508, %508 : vector<2x128xf32>
    %cst_21 = arith.constant 1.000000e+00 : f32
    %518 = vector.broadcast %cst_21 : f32 to vector<2x128xf32>
    %519 = arith.subf %518, %517 : vector<2x128xf32>
    %520 = vector.broadcast %500 : f32 to vector<2x128xf32>
    %521 = arith.mulf %520, %519 : vector<2x128xf32>
    %522 = arith.addf %493, %521 : vector<2x128xf32>
    %523 = vector.broadcast %503 : f32 to vector<2x128xf32>
    %524 = arith.mulf %523, %513 : vector<2x128xf32>
    %525 = arith.addf %496, %524 : vector<2x128xf32>
    %c18 = arith.constant 18 : index
    %526 = memref.load %arg2[%c18] : memref<226xf32, #tpu.memory_space<smem>>
    %c50 = arith.constant 50 : index
    %527 = memref.load %arg2[%c50] : memref<226xf32, #tpu.memory_space<smem>>
    %c82 = arith.constant 82 : index
    %528 = memref.load %arg2[%c82] : memref<226xf32, #tpu.memory_space<smem>>
    %c114 = arith.constant 114 : index
    %529 = memref.load %arg2[%c114] : memref<226xf32, #tpu.memory_space<smem>>
    %c146 = arith.constant 146 : index
    %530 = memref.load %arg2[%c146] : memref<226xf32, #tpu.memory_space<smem>>
    %c178 = arith.constant 178 : index
    %531 = memref.load %arg2[%c178] : memref<226xf32, #tpu.memory_space<smem>>
    %c210 = arith.constant 210 : index
    %532 = memref.load %arg2[%c210] : memref<226xf32, #tpu.memory_space<smem>>
    %533 = vector.broadcast %526 : f32 to vector<2x128xf32>
    %534 = arith.mulf %533, %0 : vector<2x128xf32>
    %535 = vector.broadcast %527 : f32 to vector<2x128xf32>
    %536 = arith.addf %534, %535 : vector<2x128xf32>
    %537 = math.tanh %536 : vector<2x128xf32>
    %538 = vector.broadcast %530 : f32 to vector<2x128xf32>
    %539 = arith.mulf %538, %0 : vector<2x128xf32>
    %540 = vector.broadcast %531 : f32 to vector<2x128xf32>
    %541 = arith.addf %539, %540 : vector<2x128xf32>
    %542 = math.tanh %541 : vector<2x128xf32>
    %543 = vector.broadcast %528 : f32 to vector<2x128xf32>
    %544 = arith.mulf %543, %537 : vector<2x128xf32>
    %545 = arith.addf %516, %544 : vector<2x128xf32>
    %546 = arith.mulf %537, %537 : vector<2x128xf32>
    %cst_22 = arith.constant 1.000000e+00 : f32
    %547 = vector.broadcast %cst_22 : f32 to vector<2x128xf32>
    %548 = arith.subf %547, %546 : vector<2x128xf32>
    %549 = vector.broadcast %529 : f32 to vector<2x128xf32>
    %550 = arith.mulf %549, %548 : vector<2x128xf32>
    %551 = arith.addf %522, %550 : vector<2x128xf32>
    %552 = vector.broadcast %532 : f32 to vector<2x128xf32>
    %553 = arith.mulf %552, %542 : vector<2x128xf32>
    %554 = arith.addf %525, %553 : vector<2x128xf32>
    %c19 = arith.constant 19 : index
    %555 = memref.load %arg2[%c19] : memref<226xf32, #tpu.memory_space<smem>>
    %c51 = arith.constant 51 : index
    %556 = memref.load %arg2[%c51] : memref<226xf32, #tpu.memory_space<smem>>
    %c83 = arith.constant 83 : index
    %557 = memref.load %arg2[%c83] : memref<226xf32, #tpu.memory_space<smem>>
    %c115 = arith.constant 115 : index
    %558 = memref.load %arg2[%c115] : memref<226xf32, #tpu.memory_space<smem>>
    %c147 = arith.constant 147 : index
    %559 = memref.load %arg2[%c147] : memref<226xf32, #tpu.memory_space<smem>>
    %c179 = arith.constant 179 : index
    %560 = memref.load %arg2[%c179] : memref<226xf32, #tpu.memory_space<smem>>
    %c211 = arith.constant 211 : index
    %561 = memref.load %arg2[%c211] : memref<226xf32, #tpu.memory_space<smem>>
    %562 = vector.broadcast %555 : f32 to vector<2x128xf32>
    %563 = arith.mulf %562, %0 : vector<2x128xf32>
    %564 = vector.broadcast %556 : f32 to vector<2x128xf32>
    %565 = arith.addf %563, %564 : vector<2x128xf32>
    %566 = math.tanh %565 : vector<2x128xf32>
    %567 = vector.broadcast %559 : f32 to vector<2x128xf32>
    %568 = arith.mulf %567, %0 : vector<2x128xf32>
    %569 = vector.broadcast %560 : f32 to vector<2x128xf32>
    %570 = arith.addf %568, %569 : vector<2x128xf32>
    %571 = math.tanh %570 : vector<2x128xf32>
    %572 = vector.broadcast %557 : f32 to vector<2x128xf32>
    %573 = arith.mulf %572, %566 : vector<2x128xf32>
    %574 = arith.addf %545, %573 : vector<2x128xf32>
    %575 = arith.mulf %566, %566 : vector<2x128xf32>
    %cst_23 = arith.constant 1.000000e+00 : f32
    %576 = vector.broadcast %cst_23 : f32 to vector<2x128xf32>
    %577 = arith.subf %576, %575 : vector<2x128xf32>
    %578 = vector.broadcast %558 : f32 to vector<2x128xf32>
    %579 = arith.mulf %578, %577 : vector<2x128xf32>
    %580 = arith.addf %551, %579 : vector<2x128xf32>
    %581 = vector.broadcast %561 : f32 to vector<2x128xf32>
    %582 = arith.mulf %581, %571 : vector<2x128xf32>
    %583 = arith.addf %554, %582 : vector<2x128xf32>
    %c20 = arith.constant 20 : index
    %584 = memref.load %arg2[%c20] : memref<226xf32, #tpu.memory_space<smem>>
    %c52 = arith.constant 52 : index
    %585 = memref.load %arg2[%c52] : memref<226xf32, #tpu.memory_space<smem>>
    %c84 = arith.constant 84 : index
    %586 = memref.load %arg2[%c84] : memref<226xf32, #tpu.memory_space<smem>>
    %c116 = arith.constant 116 : index
    %587 = memref.load %arg2[%c116] : memref<226xf32, #tpu.memory_space<smem>>
    %c148 = arith.constant 148 : index
    %588 = memref.load %arg2[%c148] : memref<226xf32, #tpu.memory_space<smem>>
    %c180 = arith.constant 180 : index
    %589 = memref.load %arg2[%c180] : memref<226xf32, #tpu.memory_space<smem>>
    %c212 = arith.constant 212 : index
    %590 = memref.load %arg2[%c212] : memref<226xf32, #tpu.memory_space<smem>>
    %591 = vector.broadcast %584 : f32 to vector<2x128xf32>
    %592 = arith.mulf %591, %0 : vector<2x128xf32>
    %593 = vector.broadcast %585 : f32 to vector<2x128xf32>
    %594 = arith.addf %592, %593 : vector<2x128xf32>
    %595 = math.tanh %594 : vector<2x128xf32>
    %596 = vector.broadcast %588 : f32 to vector<2x128xf32>
    %597 = arith.mulf %596, %0 : vector<2x128xf32>
    %598 = vector.broadcast %589 : f32 to vector<2x128xf32>
    %599 = arith.addf %597, %598 : vector<2x128xf32>
    %600 = math.tanh %599 : vector<2x128xf32>
    %601 = vector.broadcast %586 : f32 to vector<2x128xf32>
    %602 = arith.mulf %601, %595 : vector<2x128xf32>
    %603 = arith.addf %574, %602 : vector<2x128xf32>
    %604 = arith.mulf %595, %595 : vector<2x128xf32>
    %cst_24 = arith.constant 1.000000e+00 : f32
    %605 = vector.broadcast %cst_24 : f32 to vector<2x128xf32>
    %606 = arith.subf %605, %604 : vector<2x128xf32>
    %607 = vector.broadcast %587 : f32 to vector<2x128xf32>
    %608 = arith.mulf %607, %606 : vector<2x128xf32>
    %609 = arith.addf %580, %608 : vector<2x128xf32>
    %610 = vector.broadcast %590 : f32 to vector<2x128xf32>
    %611 = arith.mulf %610, %600 : vector<2x128xf32>
    %612 = arith.addf %583, %611 : vector<2x128xf32>
    %c21 = arith.constant 21 : index
    %613 = memref.load %arg2[%c21] : memref<226xf32, #tpu.memory_space<smem>>
    %c53 = arith.constant 53 : index
    %614 = memref.load %arg2[%c53] : memref<226xf32, #tpu.memory_space<smem>>
    %c85 = arith.constant 85 : index
    %615 = memref.load %arg2[%c85] : memref<226xf32, #tpu.memory_space<smem>>
    %c117 = arith.constant 117 : index
    %616 = memref.load %arg2[%c117] : memref<226xf32, #tpu.memory_space<smem>>
    %c149 = arith.constant 149 : index
    %617 = memref.load %arg2[%c149] : memref<226xf32, #tpu.memory_space<smem>>
    %c181 = arith.constant 181 : index
    %618 = memref.load %arg2[%c181] : memref<226xf32, #tpu.memory_space<smem>>
    %c213 = arith.constant 213 : index
    %619 = memref.load %arg2[%c213] : memref<226xf32, #tpu.memory_space<smem>>
    %620 = vector.broadcast %613 : f32 to vector<2x128xf32>
    %621 = arith.mulf %620, %0 : vector<2x128xf32>
    %622 = vector.broadcast %614 : f32 to vector<2x128xf32>
    %623 = arith.addf %621, %622 : vector<2x128xf32>
    %624 = math.tanh %623 : vector<2x128xf32>
    %625 = vector.broadcast %617 : f32 to vector<2x128xf32>
    %626 = arith.mulf %625, %0 : vector<2x128xf32>
    %627 = vector.broadcast %618 : f32 to vector<2x128xf32>
    %628 = arith.addf %626, %627 : vector<2x128xf32>
    %629 = math.tanh %628 : vector<2x128xf32>
    %630 = vector.broadcast %615 : f32 to vector<2x128xf32>
    %631 = arith.mulf %630, %624 : vector<2x128xf32>
    %632 = arith.addf %603, %631 : vector<2x128xf32>
    %633 = arith.mulf %624, %624 : vector<2x128xf32>
    %cst_25 = arith.constant 1.000000e+00 : f32
    %634 = vector.broadcast %cst_25 : f32 to vector<2x128xf32>
    %635 = arith.subf %634, %633 : vector<2x128xf32>
    %636 = vector.broadcast %616 : f32 to vector<2x128xf32>
    %637 = arith.mulf %636, %635 : vector<2x128xf32>
    %638 = arith.addf %609, %637 : vector<2x128xf32>
    %639 = vector.broadcast %619 : f32 to vector<2x128xf32>
    %640 = arith.mulf %639, %629 : vector<2x128xf32>
    %641 = arith.addf %612, %640 : vector<2x128xf32>
    %c22 = arith.constant 22 : index
    %642 = memref.load %arg2[%c22] : memref<226xf32, #tpu.memory_space<smem>>
    %c54 = arith.constant 54 : index
    %643 = memref.load %arg2[%c54] : memref<226xf32, #tpu.memory_space<smem>>
    %c86 = arith.constant 86 : index
    %644 = memref.load %arg2[%c86] : memref<226xf32, #tpu.memory_space<smem>>
    %c118 = arith.constant 118 : index
    %645 = memref.load %arg2[%c118] : memref<226xf32, #tpu.memory_space<smem>>
    %c150 = arith.constant 150 : index
    %646 = memref.load %arg2[%c150] : memref<226xf32, #tpu.memory_space<smem>>
    %c182 = arith.constant 182 : index
    %647 = memref.load %arg2[%c182] : memref<226xf32, #tpu.memory_space<smem>>
    %c214 = arith.constant 214 : index
    %648 = memref.load %arg2[%c214] : memref<226xf32, #tpu.memory_space<smem>>
    %649 = vector.broadcast %642 : f32 to vector<2x128xf32>
    %650 = arith.mulf %649, %0 : vector<2x128xf32>
    %651 = vector.broadcast %643 : f32 to vector<2x128xf32>
    %652 = arith.addf %650, %651 : vector<2x128xf32>
    %653 = math.tanh %652 : vector<2x128xf32>
    %654 = vector.broadcast %646 : f32 to vector<2x128xf32>
    %655 = arith.mulf %654, %0 : vector<2x128xf32>
    %656 = vector.broadcast %647 : f32 to vector<2x128xf32>
    %657 = arith.addf %655, %656 : vector<2x128xf32>
    %658 = math.tanh %657 : vector<2x128xf32>
    %659 = vector.broadcast %644 : f32 to vector<2x128xf32>
    %660 = arith.mulf %659, %653 : vector<2x128xf32>
    %661 = arith.addf %632, %660 : vector<2x128xf32>
    %662 = arith.mulf %653, %653 : vector<2x128xf32>
    %cst_26 = arith.constant 1.000000e+00 : f32
    %663 = vector.broadcast %cst_26 : f32 to vector<2x128xf32>
    %664 = arith.subf %663, %662 : vector<2x128xf32>
    %665 = vector.broadcast %645 : f32 to vector<2x128xf32>
    %666 = arith.mulf %665, %664 : vector<2x128xf32>
    %667 = arith.addf %638, %666 : vector<2x128xf32>
    %668 = vector.broadcast %648 : f32 to vector<2x128xf32>
    %669 = arith.mulf %668, %658 : vector<2x128xf32>
    %670 = arith.addf %641, %669 : vector<2x128xf32>
    %c23 = arith.constant 23 : index
    %671 = memref.load %arg2[%c23] : memref<226xf32, #tpu.memory_space<smem>>
    %c55 = arith.constant 55 : index
    %672 = memref.load %arg2[%c55] : memref<226xf32, #tpu.memory_space<smem>>
    %c87 = arith.constant 87 : index
    %673 = memref.load %arg2[%c87] : memref<226xf32, #tpu.memory_space<smem>>
    %c119 = arith.constant 119 : index
    %674 = memref.load %arg2[%c119] : memref<226xf32, #tpu.memory_space<smem>>
    %c151 = arith.constant 151 : index
    %675 = memref.load %arg2[%c151] : memref<226xf32, #tpu.memory_space<smem>>
    %c183 = arith.constant 183 : index
    %676 = memref.load %arg2[%c183] : memref<226xf32, #tpu.memory_space<smem>>
    %c215 = arith.constant 215 : index
    %677 = memref.load %arg2[%c215] : memref<226xf32, #tpu.memory_space<smem>>
    %678 = vector.broadcast %671 : f32 to vector<2x128xf32>
    %679 = arith.mulf %678, %0 : vector<2x128xf32>
    %680 = vector.broadcast %672 : f32 to vector<2x128xf32>
    %681 = arith.addf %679, %680 : vector<2x128xf32>
    %682 = math.tanh %681 : vector<2x128xf32>
    %683 = vector.broadcast %675 : f32 to vector<2x128xf32>
    %684 = arith.mulf %683, %0 : vector<2x128xf32>
    %685 = vector.broadcast %676 : f32 to vector<2x128xf32>
    %686 = arith.addf %684, %685 : vector<2x128xf32>
    %687 = math.tanh %686 : vector<2x128xf32>
    %688 = vector.broadcast %673 : f32 to vector<2x128xf32>
    %689 = arith.mulf %688, %682 : vector<2x128xf32>
    %690 = arith.addf %661, %689 : vector<2x128xf32>
    %691 = arith.mulf %682, %682 : vector<2x128xf32>
    %cst_27 = arith.constant 1.000000e+00 : f32
    %692 = vector.broadcast %cst_27 : f32 to vector<2x128xf32>
    %693 = arith.subf %692, %691 : vector<2x128xf32>
    %694 = vector.broadcast %674 : f32 to vector<2x128xf32>
    %695 = arith.mulf %694, %693 : vector<2x128xf32>
    %696 = arith.addf %667, %695 : vector<2x128xf32>
    %697 = vector.broadcast %677 : f32 to vector<2x128xf32>
    %698 = arith.mulf %697, %687 : vector<2x128xf32>
    %699 = arith.addf %670, %698 : vector<2x128xf32>
    %c24 = arith.constant 24 : index
    %700 = memref.load %arg2[%c24] : memref<226xf32, #tpu.memory_space<smem>>
    %c56 = arith.constant 56 : index
    %701 = memref.load %arg2[%c56] : memref<226xf32, #tpu.memory_space<smem>>
    %c88 = arith.constant 88 : index
    %702 = memref.load %arg2[%c88] : memref<226xf32, #tpu.memory_space<smem>>
    %c120 = arith.constant 120 : index
    %703 = memref.load %arg2[%c120] : memref<226xf32, #tpu.memory_space<smem>>
    %c152 = arith.constant 152 : index
    %704 = memref.load %arg2[%c152] : memref<226xf32, #tpu.memory_space<smem>>
    %c184 = arith.constant 184 : index
    %705 = memref.load %arg2[%c184] : memref<226xf32, #tpu.memory_space<smem>>
    %c216 = arith.constant 216 : index
    %706 = memref.load %arg2[%c216] : memref<226xf32, #tpu.memory_space<smem>>
    %707 = vector.broadcast %700 : f32 to vector<2x128xf32>
    %708 = arith.mulf %707, %0 : vector<2x128xf32>
    %709 = vector.broadcast %701 : f32 to vector<2x128xf32>
    %710 = arith.addf %708, %709 : vector<2x128xf32>
    %711 = math.tanh %710 : vector<2x128xf32>
    %712 = vector.broadcast %704 : f32 to vector<2x128xf32>
    %713 = arith.mulf %712, %0 : vector<2x128xf32>
    %714 = vector.broadcast %705 : f32 to vector<2x128xf32>
    %715 = arith.addf %713, %714 : vector<2x128xf32>
    %716 = math.tanh %715 : vector<2x128xf32>
    %717 = vector.broadcast %702 : f32 to vector<2x128xf32>
    %718 = arith.mulf %717, %711 : vector<2x128xf32>
    %719 = arith.addf %690, %718 : vector<2x128xf32>
    %720 = arith.mulf %711, %711 : vector<2x128xf32>
    %cst_28 = arith.constant 1.000000e+00 : f32
    %721 = vector.broadcast %cst_28 : f32 to vector<2x128xf32>
    %722 = arith.subf %721, %720 : vector<2x128xf32>
    %723 = vector.broadcast %703 : f32 to vector<2x128xf32>
    %724 = arith.mulf %723, %722 : vector<2x128xf32>
    %725 = arith.addf %696, %724 : vector<2x128xf32>
    %726 = vector.broadcast %706 : f32 to vector<2x128xf32>
    %727 = arith.mulf %726, %716 : vector<2x128xf32>
    %728 = arith.addf %699, %727 : vector<2x128xf32>
    %c25 = arith.constant 25 : index
    %729 = memref.load %arg2[%c25] : memref<226xf32, #tpu.memory_space<smem>>
    %c57 = arith.constant 57 : index
    %730 = memref.load %arg2[%c57] : memref<226xf32, #tpu.memory_space<smem>>
    %c89 = arith.constant 89 : index
    %731 = memref.load %arg2[%c89] : memref<226xf32, #tpu.memory_space<smem>>
    %c121 = arith.constant 121 : index
    %732 = memref.load %arg2[%c121] : memref<226xf32, #tpu.memory_space<smem>>
    %c153 = arith.constant 153 : index
    %733 = memref.load %arg2[%c153] : memref<226xf32, #tpu.memory_space<smem>>
    %c185 = arith.constant 185 : index
    %734 = memref.load %arg2[%c185] : memref<226xf32, #tpu.memory_space<smem>>
    %c217 = arith.constant 217 : index
    %735 = memref.load %arg2[%c217] : memref<226xf32, #tpu.memory_space<smem>>
    %736 = vector.broadcast %729 : f32 to vector<2x128xf32>
    %737 = arith.mulf %736, %0 : vector<2x128xf32>
    %738 = vector.broadcast %730 : f32 to vector<2x128xf32>
    %739 = arith.addf %737, %738 : vector<2x128xf32>
    %740 = math.tanh %739 : vector<2x128xf32>
    %741 = vector.broadcast %733 : f32 to vector<2x128xf32>
    %742 = arith.mulf %741, %0 : vector<2x128xf32>
    %743 = vector.broadcast %734 : f32 to vector<2x128xf32>
    %744 = arith.addf %742, %743 : vector<2x128xf32>
    %745 = math.tanh %744 : vector<2x128xf32>
    %746 = vector.broadcast %731 : f32 to vector<2x128xf32>
    %747 = arith.mulf %746, %740 : vector<2x128xf32>
    %748 = arith.addf %719, %747 : vector<2x128xf32>
    %749 = arith.mulf %740, %740 : vector<2x128xf32>
    %cst_29 = arith.constant 1.000000e+00 : f32
    %750 = vector.broadcast %cst_29 : f32 to vector<2x128xf32>
    %751 = arith.subf %750, %749 : vector<2x128xf32>
    %752 = vector.broadcast %732 : f32 to vector<2x128xf32>
    %753 = arith.mulf %752, %751 : vector<2x128xf32>
    %754 = arith.addf %725, %753 : vector<2x128xf32>
    %755 = vector.broadcast %735 : f32 to vector<2x128xf32>
    %756 = arith.mulf %755, %745 : vector<2x128xf32>
    %757 = arith.addf %728, %756 : vector<2x128xf32>
    %c26 = arith.constant 26 : index
    %758 = memref.load %arg2[%c26] : memref<226xf32, #tpu.memory_space<smem>>
    %c58 = arith.constant 58 : index
    %759 = memref.load %arg2[%c58] : memref<226xf32, #tpu.memory_space<smem>>
    %c90 = arith.constant 90 : index
    %760 = memref.load %arg2[%c90] : memref<226xf32, #tpu.memory_space<smem>>
    %c122 = arith.constant 122 : index
    %761 = memref.load %arg2[%c122] : memref<226xf32, #tpu.memory_space<smem>>
    %c154 = arith.constant 154 : index
    %762 = memref.load %arg2[%c154] : memref<226xf32, #tpu.memory_space<smem>>
    %c186 = arith.constant 186 : index
    %763 = memref.load %arg2[%c186] : memref<226xf32, #tpu.memory_space<smem>>
    %c218 = arith.constant 218 : index
    %764 = memref.load %arg2[%c218] : memref<226xf32, #tpu.memory_space<smem>>
    %765 = vector.broadcast %758 : f32 to vector<2x128xf32>
    %766 = arith.mulf %765, %0 : vector<2x128xf32>
    %767 = vector.broadcast %759 : f32 to vector<2x128xf32>
    %768 = arith.addf %766, %767 : vector<2x128xf32>
    %769 = math.tanh %768 : vector<2x128xf32>
    %770 = vector.broadcast %762 : f32 to vector<2x128xf32>
    %771 = arith.mulf %770, %0 : vector<2x128xf32>
    %772 = vector.broadcast %763 : f32 to vector<2x128xf32>
    %773 = arith.addf %771, %772 : vector<2x128xf32>
    %774 = math.tanh %773 : vector<2x128xf32>
    %775 = vector.broadcast %760 : f32 to vector<2x128xf32>
    %776 = arith.mulf %775, %769 : vector<2x128xf32>
    %777 = arith.addf %748, %776 : vector<2x128xf32>
    %778 = arith.mulf %769, %769 : vector<2x128xf32>
    %cst_30 = arith.constant 1.000000e+00 : f32
    %779 = vector.broadcast %cst_30 : f32 to vector<2x128xf32>
    %780 = arith.subf %779, %778 : vector<2x128xf32>
    %781 = vector.broadcast %761 : f32 to vector<2x128xf32>
    %782 = arith.mulf %781, %780 : vector<2x128xf32>
    %783 = arith.addf %754, %782 : vector<2x128xf32>
    %784 = vector.broadcast %764 : f32 to vector<2x128xf32>
    %785 = arith.mulf %784, %774 : vector<2x128xf32>
    %786 = arith.addf %757, %785 : vector<2x128xf32>
    %c27 = arith.constant 27 : index
    %787 = memref.load %arg2[%c27] : memref<226xf32, #tpu.memory_space<smem>>
    %c59 = arith.constant 59 : index
    %788 = memref.load %arg2[%c59] : memref<226xf32, #tpu.memory_space<smem>>
    %c91 = arith.constant 91 : index
    %789 = memref.load %arg2[%c91] : memref<226xf32, #tpu.memory_space<smem>>
    %c123 = arith.constant 123 : index
    %790 = memref.load %arg2[%c123] : memref<226xf32, #tpu.memory_space<smem>>
    %c155 = arith.constant 155 : index
    %791 = memref.load %arg2[%c155] : memref<226xf32, #tpu.memory_space<smem>>
    %c187 = arith.constant 187 : index
    %792 = memref.load %arg2[%c187] : memref<226xf32, #tpu.memory_space<smem>>
    %c219 = arith.constant 219 : index
    %793 = memref.load %arg2[%c219] : memref<226xf32, #tpu.memory_space<smem>>
    %794 = vector.broadcast %787 : f32 to vector<2x128xf32>
    %795 = arith.mulf %794, %0 : vector<2x128xf32>
    %796 = vector.broadcast %788 : f32 to vector<2x128xf32>
    %797 = arith.addf %795, %796 : vector<2x128xf32>
    %798 = math.tanh %797 : vector<2x128xf32>
    %799 = vector.broadcast %791 : f32 to vector<2x128xf32>
    %800 = arith.mulf %799, %0 : vector<2x128xf32>
    %801 = vector.broadcast %792 : f32 to vector<2x128xf32>
    %802 = arith.addf %800, %801 : vector<2x128xf32>
    %803 = math.tanh %802 : vector<2x128xf32>
    %804 = vector.broadcast %789 : f32 to vector<2x128xf32>
    %805 = arith.mulf %804, %798 : vector<2x128xf32>
    %806 = arith.addf %777, %805 : vector<2x128xf32>
    %807 = arith.mulf %798, %798 : vector<2x128xf32>
    %cst_31 = arith.constant 1.000000e+00 : f32
    %808 = vector.broadcast %cst_31 : f32 to vector<2x128xf32>
    %809 = arith.subf %808, %807 : vector<2x128xf32>
    %810 = vector.broadcast %790 : f32 to vector<2x128xf32>
    %811 = arith.mulf %810, %809 : vector<2x128xf32>
    %812 = arith.addf %783, %811 : vector<2x128xf32>
    %813 = vector.broadcast %793 : f32 to vector<2x128xf32>
    %814 = arith.mulf %813, %803 : vector<2x128xf32>
    %815 = arith.addf %786, %814 : vector<2x128xf32>
    %c28 = arith.constant 28 : index
    %816 = memref.load %arg2[%c28] : memref<226xf32, #tpu.memory_space<smem>>
    %c60 = arith.constant 60 : index
    %817 = memref.load %arg2[%c60] : memref<226xf32, #tpu.memory_space<smem>>
    %c92 = arith.constant 92 : index
    %818 = memref.load %arg2[%c92] : memref<226xf32, #tpu.memory_space<smem>>
    %c124 = arith.constant 124 : index
    %819 = memref.load %arg2[%c124] : memref<226xf32, #tpu.memory_space<smem>>
    %c156 = arith.constant 156 : index
    %820 = memref.load %arg2[%c156] : memref<226xf32, #tpu.memory_space<smem>>
    %c188 = arith.constant 188 : index
    %821 = memref.load %arg2[%c188] : memref<226xf32, #tpu.memory_space<smem>>
    %c220 = arith.constant 220 : index
    %822 = memref.load %arg2[%c220] : memref<226xf32, #tpu.memory_space<smem>>
    %823 = vector.broadcast %816 : f32 to vector<2x128xf32>
    %824 = arith.mulf %823, %0 : vector<2x128xf32>
    %825 = vector.broadcast %817 : f32 to vector<2x128xf32>
    %826 = arith.addf %824, %825 : vector<2x128xf32>
    %827 = math.tanh %826 : vector<2x128xf32>
    %828 = vector.broadcast %820 : f32 to vector<2x128xf32>
    %829 = arith.mulf %828, %0 : vector<2x128xf32>
    %830 = vector.broadcast %821 : f32 to vector<2x128xf32>
    %831 = arith.addf %829, %830 : vector<2x128xf32>
    %832 = math.tanh %831 : vector<2x128xf32>
    %833 = vector.broadcast %818 : f32 to vector<2x128xf32>
    %834 = arith.mulf %833, %827 : vector<2x128xf32>
    %835 = arith.addf %806, %834 : vector<2x128xf32>
    %836 = arith.mulf %827, %827 : vector<2x128xf32>
    %cst_32 = arith.constant 1.000000e+00 : f32
    %837 = vector.broadcast %cst_32 : f32 to vector<2x128xf32>
    %838 = arith.subf %837, %836 : vector<2x128xf32>
    %839 = vector.broadcast %819 : f32 to vector<2x128xf32>
    %840 = arith.mulf %839, %838 : vector<2x128xf32>
    %841 = arith.addf %812, %840 : vector<2x128xf32>
    %842 = vector.broadcast %822 : f32 to vector<2x128xf32>
    %843 = arith.mulf %842, %832 : vector<2x128xf32>
    %844 = arith.addf %815, %843 : vector<2x128xf32>
    %c29 = arith.constant 29 : index
    %845 = memref.load %arg2[%c29] : memref<226xf32, #tpu.memory_space<smem>>
    %c61 = arith.constant 61 : index
    %846 = memref.load %arg2[%c61] : memref<226xf32, #tpu.memory_space<smem>>
    %c93 = arith.constant 93 : index
    %847 = memref.load %arg2[%c93] : memref<226xf32, #tpu.memory_space<smem>>
    %c125 = arith.constant 125 : index
    %848 = memref.load %arg2[%c125] : memref<226xf32, #tpu.memory_space<smem>>
    %c157 = arith.constant 157 : index
    %849 = memref.load %arg2[%c157] : memref<226xf32, #tpu.memory_space<smem>>
    %c189 = arith.constant 189 : index
    %850 = memref.load %arg2[%c189] : memref<226xf32, #tpu.memory_space<smem>>
    %c221 = arith.constant 221 : index
    %851 = memref.load %arg2[%c221] : memref<226xf32, #tpu.memory_space<smem>>
    %852 = vector.broadcast %845 : f32 to vector<2x128xf32>
    %853 = arith.mulf %852, %0 : vector<2x128xf32>
    %854 = vector.broadcast %846 : f32 to vector<2x128xf32>
    %855 = arith.addf %853, %854 : vector<2x128xf32>
    %856 = math.tanh %855 : vector<2x128xf32>
    %857 = vector.broadcast %849 : f32 to vector<2x128xf32>
    %858 = arith.mulf %857, %0 : vector<2x128xf32>
    %859 = vector.broadcast %850 : f32 to vector<2x128xf32>
    %860 = arith.addf %858, %859 : vector<2x128xf32>
    %861 = math.tanh %860 : vector<2x128xf32>
    %862 = vector.broadcast %847 : f32 to vector<2x128xf32>
    %863 = arith.mulf %862, %856 : vector<2x128xf32>
    %864 = arith.addf %835, %863 : vector<2x128xf32>
    %865 = arith.mulf %856, %856 : vector<2x128xf32>
    %cst_33 = arith.constant 1.000000e+00 : f32
    %866 = vector.broadcast %cst_33 : f32 to vector<2x128xf32>
    %867 = arith.subf %866, %865 : vector<2x128xf32>
    %868 = vector.broadcast %848 : f32 to vector<2x128xf32>
    %869 = arith.mulf %868, %867 : vector<2x128xf32>
    %870 = arith.addf %841, %869 : vector<2x128xf32>
    %871 = vector.broadcast %851 : f32 to vector<2x128xf32>
    %872 = arith.mulf %871, %861 : vector<2x128xf32>
    %873 = arith.addf %844, %872 : vector<2x128xf32>
    %c30 = arith.constant 30 : index
    %874 = memref.load %arg2[%c30] : memref<226xf32, #tpu.memory_space<smem>>
    %c62 = arith.constant 62 : index
    %875 = memref.load %arg2[%c62] : memref<226xf32, #tpu.memory_space<smem>>
    %c94 = arith.constant 94 : index
    %876 = memref.load %arg2[%c94] : memref<226xf32, #tpu.memory_space<smem>>
    %c126 = arith.constant 126 : index
    %877 = memref.load %arg2[%c126] : memref<226xf32, #tpu.memory_space<smem>>
    %c158 = arith.constant 158 : index
    %878 = memref.load %arg2[%c158] : memref<226xf32, #tpu.memory_space<smem>>
    %c190 = arith.constant 190 : index
    %879 = memref.load %arg2[%c190] : memref<226xf32, #tpu.memory_space<smem>>
    %c222 = arith.constant 222 : index
    %880 = memref.load %arg2[%c222] : memref<226xf32, #tpu.memory_space<smem>>
    %881 = vector.broadcast %874 : f32 to vector<2x128xf32>
    %882 = arith.mulf %881, %0 : vector<2x128xf32>
    %883 = vector.broadcast %875 : f32 to vector<2x128xf32>
    %884 = arith.addf %882, %883 : vector<2x128xf32>
    %885 = math.tanh %884 : vector<2x128xf32>
    %886 = vector.broadcast %878 : f32 to vector<2x128xf32>
    %887 = arith.mulf %886, %0 : vector<2x128xf32>
    %888 = vector.broadcast %879 : f32 to vector<2x128xf32>
    %889 = arith.addf %887, %888 : vector<2x128xf32>
    %890 = math.tanh %889 : vector<2x128xf32>
    %891 = vector.broadcast %876 : f32 to vector<2x128xf32>
    %892 = arith.mulf %891, %885 : vector<2x128xf32>
    %893 = arith.addf %864, %892 : vector<2x128xf32>
    %894 = arith.mulf %885, %885 : vector<2x128xf32>
    %cst_34 = arith.constant 1.000000e+00 : f32
    %895 = vector.broadcast %cst_34 : f32 to vector<2x128xf32>
    %896 = arith.subf %895, %894 : vector<2x128xf32>
    %897 = vector.broadcast %877 : f32 to vector<2x128xf32>
    %898 = arith.mulf %897, %896 : vector<2x128xf32>
    %899 = arith.addf %870, %898 : vector<2x128xf32>
    %900 = vector.broadcast %880 : f32 to vector<2x128xf32>
    %901 = arith.mulf %900, %890 : vector<2x128xf32>
    %902 = arith.addf %873, %901 : vector<2x128xf32>
    %c31 = arith.constant 31 : index
    %903 = memref.load %arg2[%c31] : memref<226xf32, #tpu.memory_space<smem>>
    %c63 = arith.constant 63 : index
    %904 = memref.load %arg2[%c63] : memref<226xf32, #tpu.memory_space<smem>>
    %c95 = arith.constant 95 : index
    %905 = memref.load %arg2[%c95] : memref<226xf32, #tpu.memory_space<smem>>
    %c127 = arith.constant 127 : index
    %906 = memref.load %arg2[%c127] : memref<226xf32, #tpu.memory_space<smem>>
    %c159 = arith.constant 159 : index
    %907 = memref.load %arg2[%c159] : memref<226xf32, #tpu.memory_space<smem>>
    %c191 = arith.constant 191 : index
    %908 = memref.load %arg2[%c191] : memref<226xf32, #tpu.memory_space<smem>>
    %c223 = arith.constant 223 : index
    %909 = memref.load %arg2[%c223] : memref<226xf32, #tpu.memory_space<smem>>
    %910 = vector.broadcast %903 : f32 to vector<2x128xf32>
    %911 = arith.mulf %910, %0 : vector<2x128xf32>
    %912 = vector.broadcast %904 : f32 to vector<2x128xf32>
    %913 = arith.addf %911, %912 : vector<2x128xf32>
    %914 = math.tanh %913 : vector<2x128xf32>
    %915 = vector.broadcast %907 : f32 to vector<2x128xf32>
    %916 = arith.mulf %915, %0 : vector<2x128xf32>
    %917 = vector.broadcast %908 : f32 to vector<2x128xf32>
    %918 = arith.addf %916, %917 : vector<2x128xf32>
    %919 = math.tanh %918 : vector<2x128xf32>
    %920 = vector.broadcast %905 : f32 to vector<2x128xf32>
    %921 = arith.mulf %920, %914 : vector<2x128xf32>
    %922 = arith.addf %893, %921 : vector<2x128xf32>
    %923 = arith.mulf %914, %914 : vector<2x128xf32>
    %cst_35 = arith.constant 1.000000e+00 : f32
    %924 = vector.broadcast %cst_35 : f32 to vector<2x128xf32>
    %925 = arith.subf %924, %923 : vector<2x128xf32>
    %926 = vector.broadcast %906 : f32 to vector<2x128xf32>
    %927 = arith.mulf %926, %925 : vector<2x128xf32>
    %928 = arith.addf %899, %927 : vector<2x128xf32>
    %929 = vector.broadcast %909 : f32 to vector<2x128xf32>
    %930 = arith.mulf %929, %919 : vector<2x128xf32>
    %931 = arith.addf %902, %930 : vector<2x128xf32>
    %c224 = arith.constant 224 : index
    %932 = memref.load %arg2[%c224] : memref<226xf32, #tpu.memory_space<smem>>
    %c225 = arith.constant 225 : index
    %933 = memref.load %arg2[%c225] : memref<226xf32, #tpu.memory_space<smem>>
    %934 = vector.broadcast %932 : f32 to vector<2x128xf32>
    %935 = arith.addf %922, %934 : vector<2x128xf32>
    %936 = vector.broadcast %933 : f32 to vector<2x128xf32>
    %937 = arith.addf %931, %936 : vector<2x128xf32>
    %cst_36 = arith.constant 0.000000e+00 : f32
    %938 = vector.broadcast %cst_36 : f32 to vector<2x128xf32>
    %939 = arith.maximumf %937, %938 : vector<2x128xf32>
    %940 = math.absf %937 : vector<2x128xf32>
    %cst_37 = arith.constant 0.000000e+00 : f32
    %941 = vector.broadcast %cst_37 : f32 to vector<2x128xf32>
    %942 = arith.subf %941, %940 : vector<2x128xf32>
    %943 = math.exp %942 : vector<2x128xf32>
    %944 = math.log1p %943 : vector<2x128xf32>
    %945 = arith.addf %939, %944 : vector<2x128xf32>
    %cst_38 = arith.constant 5.000000e-01 : f32
    %946 = vector.broadcast %cst_38 : f32 to vector<2x128xf32>
    %947 = arith.mulf %946, %935 : vector<2x128xf32>
    %948 = math.tanh %947 : vector<2x128xf32>
    %cst_39 = arith.constant 1.000000e+00 : f32
    %949 = vector.broadcast %cst_39 : f32 to vector<2x128xf32>
    %950 = arith.addf %948, %949 : vector<2x128xf32>
    %cst_40 = arith.constant 5.000000e-01 : f32
    %951 = vector.broadcast %cst_40 : f32 to vector<2x128xf32>
    %952 = arith.mulf %951, %950 : vector<2x128xf32>
    %953 = arith.mulf %952, %928 : vector<2x128xf32>
    %954 = arith.mulf %953, %945 : vector<2x128xf32>
    %955 = math.sqrt %954 : vector<2x128xf32>
    %c0_41 = arith.constant 0 : index
    %c0_42 = arith.constant 0 : index
    %956 = vector.load %arg3[%c0_41, %c0_42] : memref<2x128xf32, #tpu.memory_space<vmem>>, vector<2x128xf32>
    tpu.vector_store %arg3[%c0_41, %c0_42], %955 {strides = array<i32>} : memref<2x128xf32, #tpu.memory_space<vmem>>, vector<2x128xf32>,
    return
  }
  func.func @transform_0(%arg0: i32) -> (i32, i32) {
    %c0_i32 = arith.constant 0 : i32
    %c0_i32_0 = arith.constant 0 : i32
    return %arg0, %c0_i32 : i32, i32
  }
  func.func @transform_1(%arg0: i32) -> i32 {
    %c0_i32 = arith.constant 0 : i32
    %c0_i32_0 = arith.constant 0 : i32
    return %c0_i32 : i32
  }
  func.func @transform_2(%arg0: i32) -> (i32, i32) {
    %c0_i32 = arith.constant 0 : i32
    %c0_i32_0 = arith.constant 0 : i32
    return %arg0, %c0_i32 : i32, i32
  }
}

</mosaic_0001>

<bundles_post_ra>
// kernel: tpu_custom_call.1
= control target key start
LH: loop header
LB: loop body
LE: loop exit
PB: predicated region body
PF: predicated region fallthrough
CT: control target
= control target key end

     0   :  { %7 = vsyncpa [#allocation3], 0  ;;  %s2261_s0 = inlined_call_operand.hbm [shape: f32[2,128], index: 0, kind: input, shape index: {}]   ;;  %s2262_s1 = inlined_call_operand.vmem [shape: f32[226], index: 1, kind: input, shape index: {}]   ;;  %s2263_s2 = inlined_call_operand.hbm [shape: f32[2,128], index: 2, kind: output, shape index: {}]  }
   0x1   :  { %8 = vsyncpa [#allocation5], 0 }
   0x2   :  { %9 = vsyncpa [#allocation4], 0  ;;  %s26_s11 = sshll.u32 %s2262_s1, 4  ;;  %s1412_s12 = smov [#allocation2]   ;;  %s27_s11 = int_to_ptr.vmem [resolvable:$true] %s26_s11 }
   0x3   :  { %s16_s13 = sshll.u32 %s1412_s12, 4  ;;  %s1350_s16 = scalar_lea.hbm %s2261_s0, 32  ;;  %s17_s13 = int_to_ptr.vmem [resolvable:$true] %s16_s13 }
   0x4   :  { %p1351_p0 = scmp.ne.s32.totalorder %s2261_s0, %s1350_s16  ;;  %p1354_p1 = scmp.lt.u32.totalorder %s1350_s16, %s2261_s0 }
   0x6   :  { %p1356_p2 = pnand %p1354_p1, %p1351_p0 }
   0x8   :  { %1359 = shalt.err (!%p1356_p2)
}
   0x9   :  { %s1360_s21 = scalar_lea.vmem %s17_s13, 32  ;;  %p1365_p4 = scmp.lt.s32.totalorder %s17_s13, %s17_s13 }
   0xa   :  { %p1361_p3 = scmp.ne.s32.totalorder %s17_s13, %s1360_s21  ;;  %p1366_p5 = scmp.lt.s32.totalorder %s1360_s21, %s1360_s21 }
   0xc   :  { %p1367_p6 = por %p1366_p5, %p1365_p4 }
   0xe   :  { %p1368_p7 = pnand %p1367_p6, %p1361_p3 }
  0x10   :  { %1371 = shalt.err (!%p1368_p7)
}
  0x11   :  { %19 = dma.hbm_to_vmem [thread:$0]  %s2261_s0, 32, %s17_s13, [#allocation3]  }
  0x12   :  { %s1372_s23 = scalar_lea.vmem %s27_s11, 32  ;;  %p1377_p9 = scmp.lt.s32.totalorder %s27_s11, %s27_s11 }
  0x13   :  { %p1373_p8 = scmp.ne.s32.totalorder %s27_s11, %s1372_s23  ;;  %p1378_p10 = scmp.lt.s32.totalorder %s1372_s23, %s1372_s23 }
  0x15   :  { %p1379_p11 = por %p1378_p10, %p1377_p9 }
  0x17   :  { %p1380_p12 = pnand %p1379_p11, %p1373_p8 }
  0x19   :  { %1383 = shalt.err (!%p1380_p12)
}
  0x1a   :  { %s1413_s24 = smov [#allocation6]  }
  0x1b   :  { %29 = dma.vmem_to_smem %s27_s11, 32, %s1413_s24, [#allocation5]  }
  0x1c   :  { %1406 = dma.done.wait [#allocation3], 32  }
  0x1d   :  { %1407 = vsyncadd [#allocation3], 4294967264 }
  0x1e   :  { %1408 = dma.done.wait [#allocation5], 32  }
  0x1f   :  { %1409 = vsyncadd [#allocation5], 4294967264 }
  0x20   :  { %36 = sfence }
  0x21   :  { %s38_s25 = sld [smem:[#allocation6]]  ;;  %s991_s27 = sld [smem:[#allocation6 + $0x1]]  ;;  %v1447_v1 = vld [vmem:[#allocation2] sm:$0x3] }
  0x22   :  { %s985_s26 = sld [smem:[#allocation6 + $0x20]]  ;;  %s992_s29 = sld [smem:[#allocation6 + $0x21]] }
  0x23   :  { %s988_s28 = sld [smem:[#allocation6 + $0x80]]  ;;  %s995_s0 = sld [smem:[#allocation6 + $0x81]] }
  0x24   :  { %s998_s30 = sld [smem:[#allocation6 + $0x2]]  ;;  %s1445_s3 = sld [smem:[#allocation6 + $0xa0]] }
  0x25   :  { %s1449_s4 = sld [smem:[#allocation6 + $0xa1]]  ;;  %s1451_s5 = sld [smem:[#allocation6 + $0x82]] }
  0x26   :  { %s1454_s6 = sld [smem:[#allocation6 + $0x22]]  ;;  %s1456_s7 = sld [smem:[#allocation6 + $0x3]] }
  0x27   :  { %v45_v0 = vstv %s38_s25  ;;  %v73_v2 = vstv %s991_s27  ;;  %s1459_s8 = sld [smem:[#allocation6 + $0xa2]]  ;;  %s1461_s9 = sld [smem:[#allocation6 + $0x83]] }
  0x28   :  { %v46_v3 = vmul.f32 %v45_v0, %v1447_v1  ;;  %v47_v4 = vstv %s985_s26  ;;  %v74_v5 = vmul.f32 %v73_v2, %v1447_v1  ;;  %v75_v7 = vstv %s992_s29  ;;  %s1463_s10 = sld [smem:[#allocation6 + $0x23]]  ;;  %s1466_s11 = sld [smem:[#allocation6 + $0x4]] }
  0x29   :  { %v50_v6 = vstv %s988_s28  ;;  %v78_v8 = vstv %s995_s0  ;;  %s1470_s12 = sld [smem:[#allocation6 + $0x40]]  ;;  %s1475_s13 = sld [smem:[#allocation6 + $0xa3]] }
  0x2a   :  { %v48_v9 = vadd.f32 %v47_v4, %v46_v3  ;;  %v101_v10 = vstv %s998_s30  ;;  %v51_v11 = vmul.f32 %v50_v6, %v1447_v1  ;;  %v76_v12 = vadd.f32 %v75_v7, %v74_v5  ;;  %s1477_s14 = sld [smem:[#allocation6 + $0x60]]  ;;  %s1483_s16 = sld [smem:[#allocation6 + $0x24]] }
  0x2b   :  { %v52_v13 = vstv %s1445_s3  ;;  %v79_v14 = vmul.f32 %v78_v8, %v1447_v1  ;;  %v80_v15 = vstv %s1449_s4  ;;  %v102_v16 = vmul.f32 %v101_v10, %v1447_v1  ;;  %s1479_s15 = sld [smem:[#allocation6 + $0xc0]]  ;;  %s1485_s17 = sld [smem:[#allocation6 + $0x84]] }
  0x2c   :  { %v106_v17 = vstv %s1451_s5  ;;  %1213 = vtanh.f32 %v48_v9  ;;  %v103_v18 = vstv %s1454_s6  ;;  %v129_v19 = vstv %s1456_s7  ;;  %s1487_s18 = sld [smem:[#allocation6 + $0x41]]  ;;  %s1494_s21 = sld [smem:[#allocation6 + $0x42]] }
  0x2d   :  { %v53_v20 = vadd.f32 %v52_v13, %v51_v11  ;;  %1215 = vtanh.f32 %v76_v12  ;;  %s1489_s19 = sld [smem:[#allocation6 + $0x61]]  ;;  %v81_v21 = vadd.f32 %v80_v15, %v79_v14  ;;  %v107_v22 = vmul.f32 %v106_v17, %v1447_v1  ;;  %s1499_s1 = sld [smem:[#allocation6 + $0x62]] }
  0x2e   :  { %s1492_s20 = sld [smem:[#allocation6 + $0xc1]]  ;;  %v104_v23 = vadd.f32 %v103_v18, %v102_v16  ;;  %v108_v24 = vstv %s1459_s8  ;;  %v130_v25 = vmul.f32 %v129_v19, %v1447_v1  ;;  %v134_v26 = vstv %s1461_s9  ;;  %s1502_s22 = sld [smem:[#allocation6 + $0x5]] }
  0x2f   :  { %v131_v27 = vstv %s1463_s10  ;;  %1217 = vtanh.f32 %v53_v20  ;;  %s1504_s23 = sld [smem:[#allocation6 + $0xc2]]  ;;  %s1506_s24 = sld [smem:[#allocation6 + $0xa4]]  ;;  %v157_v28 = vstv %s1466_s11  ;;  %v109_v29 = vadd.f32 %v108_v24, %v107_v22 }
  0x30   :  { %1219 = vtanh.f32 %v81_v21  ;;  %s1509_s25 = sld [smem:[#allocation6 + $0x43]]  ;;  %v135_v30 = vmul.f32 %v134_v26, %v1447_v1  ;;  %s1512_s26 = sld [smem:[#allocation6 + $0x85]]  ;;  %v132_v31 = vadd.f32 %v131_v27, %v130_v25  ;;  %v136_v32 = vstv %s1475_s13 }
  0x31   :  { %1221 = vtanh.f32 %v104_v23  ;;  %s1515_s27 = sld [smem:[#allocation6 + $0x63]]  ;;  %v158_v33 = vmul.f32 %v157_v28, %v1447_v1  ;;  %s1518_s28 = sld [smem:[#allocation6 + $0x25]]  ;;  %v55_v34 = vstv %s1470_s12  ;;  %v159_v35 = vstv %s1483_s16 }
  0x32   :  { %s1521_s29 = sld [smem:[#allocation6 + $0xc3]]  ;;  %v162_v36 = vstv %s1485_s17  ;;  %s1525_s0 = sld [smem:[#allocation6 + $0x6]]  ;;  %v60_v38 = vstv %s1477_s14  ;;  %v63_v39 = vstv %s1479_s15  ;;  %1223 = vtanh.f32 %v109_v29 }
  0x33   :  { %v137_v40 = vadd.f32 %v136_v32, %v135_v30  ;;  %s1529_s30 = sld [smem:[#allocation6 + $0x44]]  ;;  %s1531_s3 = sld [smem:[#allocation6 + $0xa5]]  ;;  %v83_v43 = vstv %s1487_s18  ;;  %v88_v44 = vstv %s1489_s19  ;;  %1225 = vtanh.f32 %v132_v31 }
  0x34   :  { %s1535_s4 = sld [smem:[#allocation6 + $0x64]]  ;;  %v160_v46 = vadd.f32 %v159_v35, %v158_v33  ;;  %v163_v47 = vmul.f32 %v162_v36, %v1447_v1  ;;  %v185_v48 = vstv %s1502_s22  ;;  %v91_v49 = vstv %s1492_s20  ;;  %s1545_s6 = sld [smem:[#allocation6 + $0x26]] }
  0x35   :  { %s1537_s5 = sld [smem:[#allocation6 + $0xc4]]  ;;  %v111_v50 = vstv %s1494_s21  ;;  %v116_v51 = vstv %s1499_s1  ;;  %v164_v52 = vstv %s1506_s24  ;;  %s1547_s7 = sld [smem:[#allocation6 + $0x86]]  ;;  %v119_v53 = vstv %s1504_s23 }
  0x36   :  { %v1214_v37 = vpop.eup %1213  ;;  %1227 = vtanh.f32 %v137_v40  ;;  %v139_v54 = vstv %s1509_s25  ;;  %s1551_s8 = sld [smem:[#allocation6 + $0x45]]  ;;  %v190_v55 = vstv %s1512_s26  ;;  %s1554_s9 = sld [smem:[#allocation6 + $0x7]]  ;;  %v186_v60 = vmul.f32 %v185_v48, %v1447_v1 }
  0x37   :  { %v1216_v41 = vpop.eup %1215  ;;  %v58_v42 = vmul.f32 %v1214_v37, %v1214_v37  ;;  %v56_v57 = vmul.f32 %v1214_v37, %v55_v34  ;;  %1229 = vtanh.f32 %v160_v46  ;;  %v165_v63 = vadd.f32 %v164_v52, %v163_v47  ;;  %s1561_s10 = sld [smem:[#allocation6 + $0xa6]]  ;;  %s1564_s11 = sld [smem:[#allocation6 + $0x87]] }
  0x38   :  { %v86_v45 = vmul.f32 %v1216_v41, %v1216_v41  ;;  %v84_v59 = vmul.f32 %v1216_v41, %v83_v43  ;;  %v187_v0 = vstv %s1518_s28  ;;  %v144_v3 = vstv %s1515_s27  ;;  %s1568_s12 = sld [smem:[#allocation6 + $0x27]]  ;;  %s1570_s13 = sld [smem:[#allocation6 + $0x8]] }
  0x39   :  { %v1218_v56 = vpop.eup %1217  ;;  %v59_v58 = vsub.f32 1.0, %v58_v42  ;;  %v147_v4 = vstv %s1521_s29  ;;  %v191_v5 = vmul.f32 %v190_v55, %v1447_v1  ;;  %v213_v6 = vstv %s1525_s0  ;;  %s1572_s14 = sld [smem:[#allocation6 + $0x65]]  ;;  %s1578_s15 = sld [smem:[#allocation6 + $0xa7]] }
  0x3a   :  { %v1220_v61 = vpop.eup %1219  ;;  %v87_v62 = vsub.f32 1.0, %v86_v45  ;;  %v64_v7 = vmul.f32 %v1218_v56, %v63_v39  ;;  %v167_v9 = vstv %s1529_s30  ;;  %v192_v10 = vstv %s1531_s3  ;;  %s1580_s16 = sld [smem:[#allocation6 + $0x88]]  ;;  %s1583_s17 = sld [smem:[#allocation6 + $0xc5]] }
  0x3b   :  { %v1222_v2 = vpop.eup %1221  ;;  %v61_v11 = vmul.f32 %v60_v38, %v59_v58  ;;  %v85_v12 = vadd.f32 %v84_v59, %v56_v57  ;;  %v92_v13 = vmul.f32 %v1220_v61, %v91_v49  ;;  %v188_v14 = vadd.f32 %v187_v0, %v186_v60  ;;  %s1587_s18 = sld [smem:[#allocation6 + $0x28]]  ;;  %s1590_s19 = sld [smem:[#allocation6 + $0x9]] }
  0x3c   :  { %v114_v8 = vmul.f32 %v1222_v2, %v1222_v2  ;;  %v1224_v15 = vpop.eup %1223  ;;  %v89_v16 = vmul.f32 %v88_v44, %v87_v62  ;;  %v112_v17 = vmul.f32 %v1222_v2, %v111_v50  ;;  %1231 = vtanh.f32 %v165_v63  ;;  %s1592_s20 = sld [smem:[#allocation6 + $0x46]]  ;;  %s1597_s21 = sld [smem:[#allocation6 + $0xa8]] }
  0x3d   :  { %v214_v18 = vmul.f32 %v213_v6, %v1447_v1  ;;  %v1226_v19 = vpop.eup %1225  ;;  %v172_v20 = vstv %s1535_s4  ;;  %v193_v21 = vadd.f32 %v192_v10, %v191_v5  ;;  %v215_v22 = vstv %s1545_s6  ;;  %s1603_s22 = sld [smem:[#allocation6 + $0x66]]  ;;  %s1607_s23 = sld [smem:[#allocation6 + $0x89]] }
  0x3e   :  { %v218_v23 = vstv %s1547_s7  ;;  %v115_v24 = vsub.f32 1.0, %v114_v8  ;;  %v175_v25 = vstv %s1537_s5  ;;  %v195_v26 = vstv %s1551_s8  ;;  %s1609_s24 = sld [smem:[#allocation6 + $0xc6]]  ;;  %s1613_s1 = sld [smem:[#allocation6 + $0x29]] }
  0x3f   :  { %v241_v27 = vstv %s1554_s9  ;;  %v93_v28 = vadd.f32 %v92_v13, %v64_v7  ;;  %v120_v29 = vmul.f32 %v1224_v15, %v119_v53  ;;  %v142_v30 = vmul.f32 %v1226_v19, %v1226_v19  ;;  %s1618_s25 = sld [smem:[#allocation6 + $0xa]]  ;;  %s1622_s26 = sld [smem:[#allocation6 + $0xa9]] }
  0x40   :  { %1233 = vtanh.f32 %v188_v14  ;;  %v1228_v31 = vpop.eup %1227  ;;  %v90_v32 = vadd.f32 %v89_v16, %v61_v11  ;;  %v113_v33 = vadd.f32 %v112_v17, %v85_v12  ;;  %v216_v34 = vadd.f32 %v215_v22, %v214_v18  ;;  %s1624_s28 = sld [smem:[#allocation6 + $0x8a]]  ;;  %s1630_s29 = sld [smem:[#allocation6 + $0x47]] }
  0x41   :  { %v219_v35 = vmul.f32 %v218_v23, %v1447_v1  ;;  %1235 = vtanh.f32 %v193_v21  ;;  %v220_v36 = vstv %s1561_s10  ;;  %v242_v37 = vmul.f32 %v241_v27, %v1447_v1  ;;  %v1230_v39 = vpop.eup %1229  ;;  %s1632_s0 = sld [smem:[#allocation6 + $0x67]]  ;;  %s1637_s27 = sld [smem:[#allocation6 + $0x2a]] }
  0x42   :  { %v246_v38 = vstv %s1564_s11  ;;  %v117_v40 = vmul.f32 %v116_v51, %v115_v24  ;;  %v140_v41 = vmul.f32 %v1226_v19, %v139_v54  ;;  %v243_v42 = vstv %s1568_s12  ;;  %s1639_s30 = sld [smem:[#allocation6 + $0xb]]  ;;  %s1644_s3 = sld [smem:[#allocation6 + $0xaa]] }
  0x43   :  { %v269_v43 = vstv %s1570_s13  ;;  %v121_v44 = vadd.f32 %v120_v29, %v93_v28  ;;  %v143_v45 = vsub.f32 1.0, %v142_v30  ;;  %v148_v46 = vmul.f32 %v1228_v31, %v147_v4  ;;  %s1649_s5 = sld [smem:[#allocation6 + $0xc7]]  ;;  %s1652_s6 = sld [smem:[#allocation6 + $0x8b]] }
  0x44   :  { %v170_v47 = vmul.f32 %v1230_v39, %v1230_v39  ;;  %v200_v48 = vstv %s1572_s14  ;;  %1237 = vtanh.f32 %v216_v34  ;;  %v221_v49 = vadd.f32 %v220_v36, %v219_v35  ;;  %s1657_s4 = sld [smem:[#allocation6 + $0x2b]]  ;;  %s1661_s7 = sld [smem:[#allocation6 + $0x48]] }
  0x45   :  { %v247_v50 = vmul.f32 %v246_v38, %v1447_v1  ;;  %v244_v51 = vadd.f32 %v243_v42, %v242_v37  ;;  %v248_v52 = vstv %s1578_s15  ;;  %v270_v53 = vmul.f32 %v269_v43, %v1447_v1  ;;  %s1666_s9 = sld [smem:[#allocation6 + $0xab]]  ;;  %s1668_s10 = sld [smem:[#allocation6 + $0xc]] }
  0x46   :  { %v274_v54 = vstv %s1580_s16  ;;  %v1232_v55 = vpop.eup %1231  ;;  %v118_v56 = vadd.f32 %v117_v40, %v90_v32  ;;  %v141_v57 = vadd.f32 %v140_v41, %v113_v33  ;;  %v203_v58 = vstv %s1583_s17  ;;  %s1672_s8 = sld [smem:[#allocation6 + $0x68]]  ;;  %s1682_s12 = sld [smem:[#allocation6 + $0x8c]] }
  0x47   :  { %v271_v59 = vstv %s1587_s18  ;;  %v145_v60 = vmul.f32 %v144_v3, %v143_v45  ;;  %v149_v61 = vadd.f32 %v148_v46, %v121_v44  ;;  %v168_v62 = vmul.f32 %v1230_v39, %v167_v9  ;;  %s1679_s11 = sld [smem:[#allocation6 + $0xc8]]  ;;  %s1685_s13 = sld [smem:[#allocation6 + $0x49]] }
  0x48   :  { %v171_v63 = vsub.f32 1.0, %v170_v47  ;;  %1239 = vtanh.f32 %v221_v49  ;;  %v249_v0 = vadd.f32 %v248_v52, %v247_v50  ;;  %v275_v2 = vmul.f32 %v274_v54, %v1447_v1  ;;  %s1688_s15 = sld [smem:[#allocation6 + $0x2c]]  ;;  %s1692_s14 = sld [smem:[#allocation6 + $0xd]] }
  0x49   :  { %v297_v4 = vstv %s1590_s19  ;;  %v176_v3 = vmul.f32 %v1232_v55, %v175_v25  ;;  %1241 = vtanh.f32 %v244_v51  ;;  %v272_v6 = vadd.f32 %v271_v59, %v270_v53  ;;  %s1696_s16 = sld [smem:[#allocation6 + $0xac]]  ;;  %s1700_s17 = sld [smem:[#allocation6 + $0x69]] }
  0x4a   :  { %v1234_v5 = vpop.eup %1233  ;;  %v276_v7 = vstv %s1597_s21  ;;  %v223_v9 = vstv %s1592_s20  ;;  %v228_v10 = vstv %s1603_s22  ;;  %v302_v11 = vstv %s1607_s23  ;;  %s1702_s18 = sld [smem:[#allocation6 + $0xc9]]  ;;  %s1707_s19 = sld [smem:[#allocation6 + $0x2d]] }
  0x4b   :  { %v198_v8 = vmul.f32 %v1234_v5, %v1234_v5  ;;  %v1236_v12 = vpop.eup %1235  ;;  %v146_v13 = vadd.f32 %v145_v60, %v118_v56  ;;  %v173_v14 = vmul.f32 %v172_v20, %v171_v63  ;;  %v231_v15 = vstv %s1609_s24  ;;  %s1709_s20 = sld [smem:[#allocation6 + $0x8d]]  ;;  %s1712_s21 = sld [smem:[#allocation6 + $0x4a]] }
  0x4c   :  { %v298_v16 = vmul.f32 %v297_v4, %v1447_v1  ;;  %v169_v17 = vadd.f32 %v168_v62, %v141_v57  ;;  %1243 = vtanh.f32 %v249_v0  ;;  %v277_v18 = vadd.f32 %v276_v7, %v275_v2  ;;  %s1717_s22 = sld [smem:[#allocation6 + $0x6a]]  ;;  %s1724_s24 = sld [smem:[#allocation6 + $0x4b]] }
  0x4d   :  { %v299_v19 = vstv %s1613_s1  ;;  %v177_v21 = vadd.f32 %v176_v3, %v149_v61  ;;  %1245 = vtanh.f32 %v272_v6  ;;  %v303_v22 = vmul.f32 %v302_v11, %v1447_v1  ;;  %s1719_s23 = sld [smem:[#allocation6 + $0xca]]  ;;  %s1727_s1 = sld [smem:[#allocation6 + $0xad]] }
  0x4e   :  { %v325_v20 = vstv %s1618_s25  ;;  %v1238_v23 = vpop.eup %1237  ;;  %v196_v24 = vmul.f32 %v1234_v5, %v195_v26  ;;  %v199_v25 = vsub.f32 1.0, %v198_v8  ;;  %v304_v27 = vstv %s1622_s26  ;;  %s1730_s25 = sld [smem:[#allocation6 + $0xe]]  ;;  %s1732_s26 = sld [smem:[#allocation6 + $0x6b]] }
  0x4f   :  { %v330_v28 = vstv %s1624_s28  ;;  %v174_v29 = vadd.f32 %v173_v14, %v146_v13  ;;  %v226_v30 = vmul.f32 %v1238_v23, %v1238_v23  ;;  %v251_v31 = vstv %s1630_s29  ;;  %s1737_s28 = sld [smem:[#allocation6 + $0xcb]]  ;;  %s1739_s29 = sld [smem:[#allocation6 + $0x4c]] }
  0x50   :  { %v300_v32 = vadd.f32 %v299_v19, %v298_v16  ;;  %v204_v33 = vmul.f32 %v1236_v12, %v203_v58  ;;  %v256_v34 = vstv %s1632_s0  ;;  %1247 = vtanh.f32 %v277_v18  ;;  %s1741_s0 = sld [smem:[#allocation6 + $0x6c]] }
  0x51   :  { %v326_v26 = vmul.f32 %v325_v20, %v1447_v1  ;;  %v305_v35 = vadd.f32 %v304_v27, %v303_v22  ;;  %v327_v36 = vstv %s1637_s27  ;;  %v331_v37 = vmul.f32 %v330_v28, %v1447_v1  ;;  %s1744_s27 = sld [smem:[#allocation6 + $0x8e]] }
  0x52   :  { %v353_v38 = vstv %s1639_s30  ;;  %v1240_v39 = vpop.eup %1239  ;;  %v197_v40 = vadd.f32 %v196_v24, %v169_v17  ;;  %v201_v41 = vmul.f32 %v200_v48, %v199_v25  ;;  %v224_v42 = vmul.f32 %v1238_v23, %v223_v9  ;;  %s1746_s30 = sld [smem:[#allocation6 + $0xcc]] }
  0x53   :  { %v332_v43 = vstv %s1644_s3  ;;  %v1242_v44 = vpop.eup %1241  ;;  %v227_v45 = vsub.f32 1.0, %v226_v30  ;;  %v259_v46 = vstv %s1649_s5  ;;  %1249 = vtanh.f32 %v300_v32  ;;  %s1750_s3 = sld [smem:[#allocation6 + $0x2e]]  ;;  %s1752_s5 = sld [smem:[#allocation6 + $0xf]] }
  0x54   :  { %v358_v47 = vstv %s1652_s6  ;;  %v205_v49 = vadd.f32 %v204_v33, %v177_v21  ;;  %v254_v48 = vmul.f32 %v1242_v44, %v1242_v44  ;;  %v328_v50 = vadd.f32 %v327_v36, %v326_v26  ;;  %s1757_s6 = sld [smem:[#allocation6 + $0x4d]] }
  0x55   :  { %v354_v51 = vmul.f32 %v353_v38, %v1447_v1  ;;  %v232_v52 = vmul.f32 %v1240_v39, %v231_v15  ;;  %1251 = vtanh.f32 %v305_v35  ;;  %v333_v53 = vadd.f32 %v332_v43, %v331_v37 }
  0x56   :  { %v355_v54 = vstv %s1657_s4  ;;  %v1244_v55 = vpop.eup %1243  ;;  %v202_v56 = vadd.f32 %v201_v41, %v174_v29  ;;  %v225_v57 = vadd.f32 %v224_v42, %v197_v40  ;;  %v279_v58 = vstv %s1661_s7  ;;  %s1760_s4 = sld [smem:[#allocation6 + $0x6d]]  ;;  %s1763_s7 = sld [smem:[#allocation6 + $0xae]] }
  0x57   :  { %v359_v59 = vmul.f32 %v358_v47, %v1447_v1  ;;  %v1246_v60 = vpop.eup %1245  ;;  %v229_v61 = vmul.f32 %v228_v10, %v227_v45  ;;  %v252_v62 = vmul.f32 %v1242_v44, %v251_v31  ;;  %v360_v63 = vstv %s1666_s9  ;;  %s1765_s9 = sld [smem:[#allocation6 + $0xcd]] }
  0x58   :  { %v381_v0 = vstv %s1668_s10  ;;  %v255_v2 = vsub.f32 1.0, %v254_v48  ;;  %v282_v4 = vmul.f32 %v1246_v60, %v1246_v60  ;;  %1253 = vtanh.f32 %v328_v50  ;;  %s1769_s10 = sld [smem:[#allocation6 + $0x8f]] }
  0x59   :  { %v356_v5 = vadd.f32 %v355_v54, %v354_v51  ;;  %v233_v3 = vadd.f32 %v232_v52, %v205_v49  ;;  %v260_v6 = vmul.f32 %v1244_v55, %v259_v46  ;;  %v284_v7 = vstv %s1672_s8  ;;  %s1771_s8 = sld [smem:[#allocation6 + $0x2f]] }
  0x5a   :  { %1255 = vtanh.f32 %v333_v53  ;;  %v1248_v8 = vpop.eup %1247  ;;  %v287_v9 = vstv %s1679_s11  ;;  %v361_v10 = vadd.f32 %v360_v63, %v359_v59  ;;  %v382_v11 = vmul.f32 %v381_v0, %v1447_v1  ;;  %s1773_s11 = sld [smem:[#allocation6 + $0x10]] }
  0x5b   :  { %v386_v12 = vstv %s1682_s12  ;;  %v230_v13 = vadd.f32 %v229_v61, %v202_v56  ;;  %v253_v14 = vadd.f32 %v252_v62, %v225_v57  ;;  %v307_v15 = vstv %s1685_s13  ;;  %s1782_s12 = sld [smem:[#allocation6 + $0x4e]]  ;;  %s1785_s13 = sld [smem:[#allocation6 + $0xaf]] }
  0x5c   :  { %v383_v16 = vstv %s1688_s15  ;;  %v257_v17 = vmul.f32 %v256_v34, %v255_v2  ;;  %v280_v18 = vmul.f32 %v1246_v60, %v279_v58  ;;  %v283_v19 = vsub.f32 1.0, %v282_v4  ;;  %s1788_s15 = sld [smem:[#allocation6 + $0x30]] }
  0x5d   :  { %1257 = vtanh.f32 %v356_v5  ;;  %v1250_v21 = vpop.eup %1249  ;;  %v261_v22 = vadd.f32 %v260_v6, %v233_v3  ;;  %v288_v20 = vmul.f32 %v1248_v8, %v287_v9  ;;  %v387_v23 = vmul.f32 %v386_v12, %v1447_v1 }
  0x5e   :  { %v409_v24 = vstv %s1692_s14  ;;  %v310_v25 = vmul.f32 %v1250_v21, %v1250_v21  ;;  %1259 = vtanh.f32 %v361_v10  ;;  %v384_v27 = vadd.f32 %v383_v16, %v382_v11  ;;  %s1790_s14 = sld [smem:[#allocation6 + $0x90]] }
  0x5f   :  { %v388_v28 = vstv %s1696_s16  ;;  %v1252_v29 = vpop.eup %1251  ;;  %v312_v30 = vstv %s1700_s17  ;;  %v315_v31 = vstv %s1702_s18  ;;  %v258_v32 = vadd.f32 %v257_v17, %v230_v13  ;;  %s1792_s16 = sld [smem:[#allocation6 + $0x6e]]  ;;  %s1795_s17 = sld [smem:[#allocation6 + $0x11]] }
  0x60   :  { %v281_v33 = vadd.f32 %v280_v18, %v253_v14  ;;  %v285_v34 = vmul.f32 %v284_v7, %v283_v19  ;;  %v410_v26 = vmul.f32 %v409_v24, %v1447_v1  ;;  %v308_v35 = vmul.f32 %v1250_v21, %v307_v15  ;;  %s1797_s18 = sld [smem:[#allocation6 + $0xce]] }
  0x61   :  { %v389_v36 = vadd.f32 %v388_v28, %v387_v23  ;;  %v411_v37 = vstv %s1707_s19  ;;  %v414_v38 = vstv %s1709_s20  ;;  %v289_v40 = vadd.f32 %v288_v20, %v261_v22  ;;  %s1801_s19 = sld [smem:[#allocation6 + $0x4f]]  ;;  %s1808_s20 = sld [smem:[#allocation6 + $0xb0]] }
  0x62   :  { %v1254_v39 = vpop.eup %1253  ;;  %v311_v41 = vsub.f32 1.0, %v310_v25  ;;  %v316_v42 = vmul.f32 %v1252_v29, %v315_v31  ;;  %1261 = vtanh.f32 %v384_v27  ;;  %v335_v44 = vstv %s1712_s21  ;;  %s1811_s21 = sld [smem:[#allocation6 + $0x91]] }
  0x63   :  { %v338_v45 = vmul.f32 %v1254_v39, %v1254_v39  ;;  %v340_v46 = vstv %s1717_s22  ;;  %v343_v47 = vstv %s1719_s23  ;;  %v286_v49 = vadd.f32 %v285_v34, %v258_v32  ;;  %s1813_s22 = sld [smem:[#allocation6 + $0x31]]  ;;  %s1815_s23 = sld [smem:[#allocation6 + $0x12]] }
  0x64   :  { %v1256_v43 = vpop.eup %1255  ;;  %v363_v48 = vstv %s1724_s24  ;;  %v412_v50 = vadd.f32 %v411_v37, %v410_v26  ;;  %v415_v51 = vmul.f32 %v414_v38, %v1447_v1  ;;  %v309_v52 = vadd.f32 %v308_v35, %v281_v33  ;;  %s1817_s24 = sld [smem:[#allocation6 + $0x6f]] }
  0x65   :  { %1263 = vtanh.f32 %v389_v36  ;;  %v416_v53 = vstv %s1727_s1  ;;  %v437_v54 = vstv %s1730_s25  ;;  %v313_v56 = vmul.f32 %v312_v30, %v311_v41  ;;  %s1819_s1 = sld [smem:[#allocation6 + $0xcf]]  ;;  %s1827_s25 = sld [smem:[#allocation6 + $0xb1]] }
  0x66   :  { %v317_v57 = vadd.f32 %v316_v42, %v289_v40  ;;  %v336_v58 = vmul.f32 %v1254_v39, %v335_v44  ;;  %v344_v59 = vmul.f32 %v1256_v43, %v343_v47  ;;  %v339_v60 = vsub.f32 1.0, %v338_v45 }
  0x67   :  { %v1258_v55 = vpop.eup %1257  ;;  %v368_v62 = vstv %s1732_s26  ;;  %v371_v63 = vstv %s1737_s28  ;;  %1265 = vtanh.f32 %v412_v50  ;;  %v417_v2 = vadd.f32 %v416_v53, %v415_v51  ;;  %s1829_s26 = sld [smem:[#allocation6 + $0x92]]  ;;  %s1832_s28 = sld [smem:[#allocation6 + $0x50]] }
  0x68   :  { %v366_v61 = vmul.f32 %v1258_v55, %v1258_v55  ;;  %v1260_v0 = vpop.eup %1259  ;;  %v438_v4 = vmul.f32 %v437_v54, %v1447_v1  ;;  %v442_v5 = vstv %s1744_s27  ;;  %v391_v3 = vstv %s1739_s29  ;;  %s1835_s29 = sld [smem:[#allocation6 + $0x32]]  ;;  %s1838_s27 = sld [smem:[#allocation6 + $0x70]] }
  0x69   :  { %v396_v6 = vstv %s1741_s0  ;;  %v399_v7 = vstv %s1746_s30  ;;  %v439_v8 = vstv %s1750_s3  ;;  %v314_v9 = vadd.f32 %v313_v56, %v286_v49  ;;  %s1840_s30 = sld [smem:[#allocation6 + $0x13]]  ;;  %s1848_s3 = sld [smem:[#allocation6 + $0xb2]] }
  0x6a   :  { %v337_v10 = vadd.f32 %v336_v58, %v309_v52  ;;  %v345_v11 = vadd.f32 %v344_v59, %v317_v57  ;;  %v465_v12 = vstv %s1752_s5  ;;  %v341_v13 = vmul.f32 %v340_v46, %v339_v60  ;;  %s1850_s5 = sld [smem:[#allocation6 + $0xd0]]  ;;  %s1854_s0 = sld [smem:[#allocation6 + $0x93]] }
  0x6b   :  { %v364_v14 = vmul.f32 %v1258_v55, %v363_v48  ;;  %v372_v15 = vmul.f32 %v1260_v0, %v371_v63  ;;  %v443_v16 = vmul.f32 %v442_v5, %v1447_v1  ;;  %v367_v18 = vsub.f32 1.0, %v366_v61 }
  0x6c   :  { %v1262_v17 = vpop.eup %1261  ;;  %1267 = vtanh.f32 %v417_v2  ;;  %v440_v19 = vadd.f32 %v439_v8, %v438_v4  ;;  %v444_v21 = vstv %s1763_s7  ;;  %v419_v20 = vstv %s1757_s6  ;;  %s1859_s6 = sld [smem:[#allocation6 + $0x33]]  ;;  %s1862_s7 = sld [smem:[#allocation6 + $0x14]] }
  0x6d   :  { %v394_v22 = vmul.f32 %v1262_v17, %v1262_v17  ;;  %v466_v23 = vmul.f32 %v465_v12, %v1447_v1  ;;  %v470_v24 = vstv %s1769_s10  ;;  %v424_v25 = vstv %s1760_s4  ;;  %s1866_s10 = sld [smem:[#allocation6 + $0x71]]  ;;  %s1882_s4 = sld [smem:[#allocation6 + $0x34]] }
  0x6e   :  { %v427_v27 = vstv %s1765_s9  ;;  %v467_v28 = vstv %s1771_s8  ;;  %v493_v29 = vstv %s1773_s11  ;;  %v342_v31 = vadd.f32 %v341_v13, %v314_v9  ;;  %s1864_s9 = sld [smem:[#allocation6 + $0x51]]  ;;  %s1874_s8 = sld [smem:[#allocation6 + $0xb3]] }
  0x6f   :  { %v1264_v30 = vpop.eup %1263  ;;  %v365_v32 = vadd.f32 %v364_v14, %v337_v10  ;;  %v373_v33 = vadd.f32 %v372_v15, %v345_v11  ;;  %v445_v34 = vadd.f32 %v444_v21, %v443_v16  ;;  %v369_v26 = vmul.f32 %v368_v62, %v367_v18  ;;  %s1876_s11 = sld [smem:[#allocation6 + $0x94]] }
  0x70   :  { %v392_v35 = vmul.f32 %v1262_v17, %v391_v3  ;;  %1269 = vtanh.f32 %v440_v19  ;;  %v471_v36 = vmul.f32 %v470_v24, %v1447_v1  ;;  %v395_v37 = vsub.f32 1.0, %v394_v22 }
  0x71   :  { %v468_v38 = vadd.f32 %v467_v28, %v466_v23  ;;  %v472_v39 = vstv %s1785_s13  ;;  %v494_v40 = vmul.f32 %v493_v29, %v1447_v1  ;;  %v1266_v41 = vpop.eup %1265  ;;  %v400_v42 = vmul.f32 %v1264_v30, %v399_v7  ;;  %s1886_s13 = sld [smem:[#allocation6 + $0xd1]] }
  0x72   :  { %v447_v43 = vstv %s1782_s12  ;;  %v495_v44 = vstv %s1788_s15  ;;  %v498_v45 = vstv %s1790_s14  ;;  %v422_v46 = vmul.f32 %v1266_v41, %v1266_v41  ;;  %s1884_s12 = sld [smem:[#allocation6 + $0x15]]  ;;  %s1892_s15 = sld [smem:[#allocation6 + $0xb4]] }
  0x73   :  { %1271 = vtanh.f32 %v445_v34  ;;  %v452_v47 = vstv %s1792_s16  ;;  %v521_v49 = vstv %s1795_s17  ;;  %v370_v48 = vadd.f32 %v369_v26, %v342_v31  ;;  %s1897_s14 = sld [smem:[#allocation6 + $0x95]]  ;;  %s1899_s17 = sld [smem:[#allocation6 + $0x52]] }
  0x74   :  { %v393_v50 = vadd.f32 %v392_v35, %v365_v32  ;;  %v455_v51 = vstv %s1797_s18  ;;  %v473_v52 = vadd.f32 %v472_v39, %v471_v36  ;;  %v397_v53 = vmul.f32 %v396_v6, %v395_v37  ;;  %s1908_s18 = sld [smem:[#allocation6 + $0x16]]  ;;  %s1930_s16 = sld [smem:[#allocation6 + $0x17]] }
  0x75   :  { %1273 = vtanh.f32 %v468_v38  ;;  %v496_v54 = vadd.f32 %v495_v44, %v494_v40  ;;  %v499_v55 = vmul.f32 %v498_v45, %v1447_v1  ;;  %v401_v57 = vadd.f32 %v400_v42, %v373_v33  ;;  %v1905_v42 = vld [vmem:[#allocation2] sm:$0x3] }
  0x76   :  { %v1268_v56 = vpop.eup %1267  ;;  %v500_v58 = vstv %s1808_s20  ;;  %v522_v59 = vmul.f32 %v521_v49, %v1447_v1  ;;  %v526_v60 = vstv %s1811_s21  ;;  %v420_v61 = vmul.f32 %v1266_v41, %v419_v20  ;;  %s1915_s20 = sld [smem:[#allocation6 + $0xd2]]  ;;  %s1918_s21 = sld [smem:[#allocation6 + $0xb5]] }
  0x77   :  { %v423_v62 = vsub.f32 1.0, %v422_v46  ;;  %v523_v63 = vstv %s1813_s22  ;;  %v549_v0 = vstv %s1815_s23  ;;  %1275 = vtanh.f32 %v473_v52  ;;  %s1924_s22 = sld [smem:[#allocation6 + $0x36]] }
  0x78   :  { %v475_v2 = vstv %s1801_s19  ;;  %v480_v4 = vstv %s1817_s24  ;;  %v483_v5 = vstv %s1819_s1  ;;  %v428_v3 = vmul.f32 %v1268_v56, %v427_v27  ;;  %s1902_s19 = sld [smem:[#allocation6 + $0x35]]  ;;  %s1926_s23 = sld [smem:[#allocation6 + $0x96]] }
  0x79   :  { %1277 = vtanh.f32 %v496_v54  ;;  %v501_v6 = vadd.f32 %v500_v58, %v499_v55  ;;  %v527_v7 = vmul.f32 %v526_v60, %v1447_v1  ;;  %v524_v9 = vadd.f32 %v523_v63, %v522_v59  ;;  %s1933_s1 = sld [smem:[#allocation6 + $0x53]] }
  0x7a   :  { %v1270_v8 = vpop.eup %1269  ;;  %v528_v10 = vstv %s1827_s25  ;;  %v550_v11 = vmul.f32 %v549_v0, %v1447_v1  ;;  %v554_v12 = vstv %s1829_s26  ;;  %v398_v13 = vadd.f32 %v397_v53, %v370_v48  ;;  %s1941_s25 = sld [smem:[#allocation6 + $0xb6]]  ;;  %s1943_s26 = sld [smem:[#allocation6 + $0x97]] }
  0x7b   :  { %v421_v14 = vadd.f32 %v420_v61, %v393_v50  ;;  %v425_v15 = vmul.f32 %v424_v25, %v423_v62  ;;  %v551_v16 = vstv %s1835_s29  ;;  %v450_v17 = vmul.f32 %v1270_v8, %v1270_v8  ;;  %s1948_s29 = sld [smem:[#allocation6 + $0x37]]  ;;  %s1950_s24 = sld [smem:[#allocation6 + $0xd3]] }
  0x7c   :  { %v503_v18 = vstv %s1832_s28  ;;  %v508_v19 = vstv %s1838_s27  ;;  %v577_v21 = vstv %s1840_s30  ;;  %v448_v20 = vmul.f32 %v1270_v8, %v447_v43  ;;  %s1945_s28 = sld [smem:[#allocation6 + $0x72]]  ;;  %s1958_s30 = sld [smem:[#allocation6 + $0xb7]] }
  0x7d   :  { %v1272_v22 = vpop.eup %1271  ;;  %1279 = vtanh.f32 %v501_v6  ;;  %v529_v23 = vadd.f32 %v528_v10, %v527_v7  ;;  %v555_v24 = vmul.f32 %v554_v12, %v1447_v1  ;;  %v429_v25 = vadd.f32 %v428_v3, %v401_v57  ;;  %s1980_s27 = sld [smem:[#allocation6 + $0xb8]] }
  0x7e   :  { %1281 = vtanh.f32 %v524_v9  ;;  %v552_v27 = vadd.f32 %v551_v16, %v550_v11  ;;  %v556_v28 = vstv %s1848_s3  ;;  %v426_v30 = vadd.f32 %v425_v15, %v398_v13  ;;  %s1960_s3 = sld [smem:[#allocation6 + $0x18]] }
  0x7f   :  { %v1274_v29 = vpop.eup %1273  ;;  %v511_v31 = vstv %s1850_s5  ;;  %v578_v32 = vmul.f32 %v577_v21, %v1447_v1  ;;  %v582_v33 = vstv %s1854_s0  ;;  %v451_v34 = vsub.f32 1.0, %v450_v17  ;;  %s1962_s5 = sld [smem:[#allocation6 + $0x54]] }
  0x80   :  { %v456_v26 = vmul.f32 %v1272_v22, %v455_v51  ;;  %v478_v35 = vmul.f32 %v1274_v29, %v1274_v29  ;;  %v579_v36 = vstv %s1859_s6  ;;  %v449_v37 = vadd.f32 %v448_v20, %v421_v14  ;;  %s1964_s0 = sld [smem:[#allocation6 + $0xd4]]  ;;  %s1969_s6 = sld [smem:[#allocation6 + $0x38]] }
  0x81   :  { %1283 = vtanh.f32 %v529_v23  ;;  %v557_v1 = vadd.f32 %v556_v28, %v555_v24  ;;  %v605_v38 = vstv %s1862_s7  ;;  %v1276_v39 = vpop.eup %1275  ;;  %v476_v40 = vmul.f32 %v1274_v29, %v475_v2  ;;  %s1971_s7 = sld [smem:[#allocation6 + $0x98]] }
  0x82   :  { %v531_v41 = vstv %s1864_s9  ;;  %1285 = vtanh.f32 %v552_v27  ;;  %v583_v43 = vmul.f32 %v1905_v42, %v582_v33  ;;  %v536_v45 = vstv %s1866_s10  ;;  %s1982_s9 = sld [smem:[#allocation6 + $0x19]]  ;;  %s2039_s10 = sld [smem:[#allocation6 + $0x1b]] }
  0x83   :  { %v1278_v44 = vpop.eup %1277  ;;  %v580_v46 = vadd.f32 %v579_v36, %v578_v32  ;;  %v584_v49 = vstv %s1874_s8  ;;  %v610_v48 = vstv %s1876_s11  ;;  %v453_v50 = vmul.f32 %v452_v47, %v451_v34  ;;  %s1985_s8 = sld [smem:[#allocation6 + $0x55]]  ;;  %s1991_s11 = sld [smem:[#allocation6 + $0x99]] }
  0x84   :  { %v457_v51 = vadd.f32 %v456_v26, %v429_v25  ;;  %v479_v52 = vsub.f32 1.0, %v478_v35  ;;  %v606_v53 = vmul.f32 %v1905_v42, %v605_v38  ;;  %v484_v54 = vmul.f32 %v1276_v39, %v483_v5 }
  0x85   :  { %1287 = vtanh.f32 %v557_v1  ;;  %v607_v55 = vstv %s1882_s4  ;;  %v633_v56 = vstv %s1884_s12  ;;  %v477_v47 = vadd.f32 %v476_v40, %v449_v37  ;;  %s1995_s4 = sld [smem:[#allocation6 + $0x39]]  ;;  %s1997_s12 = sld [smem:[#allocation6 + $0xd5]] }
  0x86   :  { %v539_v57 = vstv %s1886_s13  ;;  %v585_v58 = vadd.f32 %v584_v49, %v583_v43  ;;  %v611_v59 = vmul.f32 %v1905_v42, %v610_v48  ;;  %v504_v61 = vmul.f32 %v1278_v44, %v503_v18  ;;  %s2001_s13 = sld [smem:[#allocation6 + $0xb9]] }
  0x87   :  { %v1280_v60 = vpop.eup %1279  ;;  %v506_v62 = vmul.f32 %v1278_v44, %v1278_v44  ;;  %1289 = vtanh.f32 %v580_v46  ;;  %v612_v63 = vstv %s1892_s15  ;;  %v454_v2 = vadd.f32 %v453_v50, %v426_v30  ;;  %s2007_s15 = sld [smem:[#allocation6 + $0x56]] }
  0x88   :  { %v1282_v0 = vpop.eup %1281  ;;  %v608_v5 = vadd.f32 %v607_v55, %v606_v53  ;;  %v634_v3 = vmul.f32 %v1905_v42, %v633_v56  ;;  %v638_v6 = vstv %s1897_s14  ;;  %v481_v7 = vmul.f32 %v480_v4, %v479_v52  ;;  %s2009_s14 = sld [smem:[#allocation6 + $0xd6]] }
  0x89   :  { %v485_v8 = vadd.f32 %v484_v54, %v457_v51  ;;  %v559_v9 = vstv %s1899_s17  ;;  %v635_v10 = vstv %s1902_s19  ;;  %v512_v11 = vmul.f32 %v1280_v60, %v511_v31  ;;  %s2018_s17 = sld [smem:[#allocation6 + $0x1a]] }
  0x8a   :  { %1291 = vtanh.f32 %v585_v58  ;;  %v613_v12 = vadd.f32 %v612_v63, %v611_v59  ;;  %v661_v13 = vstv %s1908_s18  ;;  %v505_v14 = vadd.f32 %v504_v61, %v477_v47  ;;  %s2020_s19 = sld [smem:[#allocation6 + $0x9a]] }
  0x8b   :  { %v1284_v4 = vpop.eup %1283  ;;  %v507_v15 = vsub.f32 1.0, %v506_v62  ;;  %v532_v16 = vmul.f32 %v1282_v0, %v531_v41  ;;  %v639_v17 = vmul.f32 %v1905_v42, %v638_v6  ;;  %1293 = vtanh.f32 %v608_v5  ;;  %s2027_s18 = sld [smem:[#allocation6 + $0x3a]] }
  0x8c   :  { %v1286_v18 = vpop.eup %1285  ;;  %v636_v21 = vadd.f32 %v635_v10, %v634_v3  ;;  %v640_v22 = vstv %s1918_s21  ;;  %v662_v20 = vmul.f32 %v1905_v42, %v661_v13  ;;  %v482_v23 = vadd.f32 %v481_v7, %v454_v2  ;;  %s2031_s21 = sld [smem:[#allocation6 + $0x57]] }
  0x8d   :  { %v567_v24 = vstv %s1915_s20  ;;  %v663_v25 = vstv %s1924_s22  ;;  %v666_v27 = vstv %s1926_s23  ;;  %v513_v28 = vadd.f32 %v512_v11, %v485_v8  ;;  %s2029_s20 = sld [smem:[#allocation6 + $0xba]]  ;;  %s2033_s22 = sld [smem:[#allocation6 + $0xd7]] }
  0x8e   :  { %v540_v29 = vmul.f32 %v1284_v4, %v539_v57  ;;  %1295 = vtanh.f32 %v613_v12  ;;  %v689_v30 = vstv %s1930_s16  ;;  %v509_v32 = vmul.f32 %v508_v19, %v507_v15  ;;  %s2044_s23 = sld [smem:[#allocation6 + $0x9b]] }
  0x8f   :  { %v1288_v31 = vpop.eup %1287  ;;  %v533_v33 = vadd.f32 %v532_v16, %v505_v14  ;;  %v560_v34 = vmul.f32 %v1286_v18, %v559_v9  ;;  %v641_v26 = vadd.f32 %v640_v22, %v639_v17  ;;  %v587_v35 = vstv %s1933_s1  ;;  %s2046_s16 = sld [smem:[#allocation6 + $0xbb]] }
  0x90   :  { %1297 = vtanh.f32 %v636_v21  ;;  %v664_v36 = vadd.f32 %v663_v25, %v662_v20  ;;  %v667_v37 = vmul.f32 %v1905_v42, %v666_v27  ;;  %v534_v38 = vmul.f32 %v1282_v0, %v1282_v0  ;;  %s2056_s1 = sld [smem:[#allocation6 + $0x73]] }
  0x91   :  { %v1975_v1 = vpop.eup %1289  ;;  %v668_v39 = vstv %s1941_s25  ;;  %v690_v19 = vmul.f32 %v1905_v42, %v689_v30  ;;  %v694_v40 = vstv %s1943_s26  ;;  %v541_v41 = vadd.f32 %v540_v29, %v513_v28  ;;  %s2059_s25 = sld [smem:[#allocation6 + $0x3b]]  ;;  %s2061_s26 = sld [smem:[#allocation6 + $0x58]] }
  0x92   :  { %v564_v43 = vstv %s1945_s28  ;;  %v568_v44 = vmul.f32 %v1288_v31, %v567_v24  ;;  %v691_v46 = vstv %s1948_s29  ;;  %v1988_v49 = vadd.f32 %v509_v32, %v482_v23  ;;  %s2066_s28 = sld [smem:[#allocation6 + $0x1c]]  ;;  %s2068_s29 = sld [smem:[#allocation6 + $0xd8]] }
  0x93   :  { %v561_v48 = vadd.f32 %v560_v34, %v533_v33  ;;  %v595_v50 = vstv %s1950_s24  ;;  %1299 = vtanh.f32 %v641_v26  ;;  %v588_v52 = vmul.f32 %v1975_v1, %v587_v35  ;;  %s2080_s24 = sld [smem:[#allocation6 + $0x3c]] }
  0x94   :  { %v1292_v51 = vpop.eup %1291  ;;  %1301 = vtanh.f32 %v664_v36  ;;  %v669_v53 = vadd.f32 %v668_v39, %v667_v37  ;;  %v695_v54 = vmul.f32 %v1905_v42, %v694_v40  ;;  %v535_v55 = vsub.f32 1.0, %v534_v38 }
  0x95   :  { %v692_v56 = vadd.f32 %v691_v46, %v690_v19  ;;  %v696_v47 = vstv %s1958_s30  ;;  %v717_v57 = vstv %s1960_s3  ;;  %v2003_v58 = vpop.eup %1293  ;;  %v562_v59 = vmul.f32 %v1286_v18, %v1286_v18  ;;  %s2082_s30 = sld [smem:[#allocation6 + $0x9c]]  ;;  %s2085_s3 = sld [smem:[#allocation6 + $0x59]] }
  0x96   :  { %v569_v60 = vadd.f32 %v568_v44, %v541_v41  ;;  %v615_v61 = vstv %s1962_s5  ;;  %v623_v62 = vstv %s1964_s0  ;;  %v596_v63 = vmul.f32 %v1292_v51, %v595_v50  ;;  %s2089_s5 = sld [smem:[#allocation6 + $0xbc]]  ;;  %s2092_s0 = sld [smem:[#allocation6 + $0xd9]] }
  0x97   :  { %v718_v0 = vmul.f32 %v1905_v42, %v717_v57  ;;  %v719_v2 = vstv %s1969_s6  ;;  %v722_v5 = vstv %s1971_s7  ;;  %v589_v6 = vadd.f32 %v588_v52, %v561_v48  ;;  %s2096_s6 = sld [smem:[#allocation6 + $0x1d]] }
  0x98   :  { %v1296_v3 = vpop.eup %1295  ;;  %1303 = vtanh.f32 %v669_v53  ;;  %v697_v7 = vadd.f32 %v696_v47, %v695_v54  ;;  %v723_v8 = vmul.f32 %v1905_v42, %v722_v5  ;;  %v616_v9 = vmul.f32 %v2003_v58, %v615_v61  ;;  %s2100_s7 = sld [smem:[#allocation6 + $0x3d]] }
  0x99   :  { %1305 = vtanh.f32 %v692_v56  ;;  %v724_v10 = vstv %s1980_s27  ;;  %v745_v11 = vstv %s1982_s9  ;;  %v537_v13 = vmul.f32 %v536_v45, %v535_v55  ;;  %s2102_s27 = sld [smem:[#allocation6 + $0x9d]]  ;;  %s2111_s9 = sld [smem:[#allocation6 + $0x74]] }
  0x9a   :  { %v2022_v12 = vpop.eup %1297  ;;  %v563_v4 = vsub.f32 1.0, %v562_v59  ;;  %v643_v14 = vstv %s1985_s8  ;;  %v720_v15 = vadd.f32 %v719_v2, %v718_v0  ;;  %v597_v16 = vadd.f32 %v596_v63, %v569_v60  ;;  %s2114_s8 = sld [smem:[#allocation6 + $0xbd]] }
  0x9b   :  { %v624_v17 = vmul.f32 %v1296_v3, %v623_v62  ;;  %v746_v18 = vmul.f32 %v1905_v42, %v745_v11  ;;  %v750_v21 = vstv %s1991_s11  ;;  %1307 = vtanh.f32 %v697_v7  ;;  %s2118_s11 = sld [smem:[#allocation6 + $0xda]] }
  0x9c   :  { %v725_v45 = vadd.f32 %v724_v10, %v723_v8  ;;  %v747_v22 = vstv %s1995_s4  ;;  %v751_v20 = vmul.f32 %v1905_v42, %v750_v21  ;;  %v617_v24 = vadd.f32 %v616_v9, %v589_v6  ;;  %s2121_s4 = sld [smem:[#allocation6 + $0x5a]] }
  0x9d   :  { %v1300_v23 = vpop.eup %1299  ;;  %v644_v25 = vmul.f32 %v2022_v12, %v643_v14  ;;  %v651_v27 = vstv %s1997_s12  ;;  %v752_v28 = vstv %s2001_s13  ;;  %v671_v30 = vstv %s2007_s15  ;;  %s2126_s12 = sld [smem:[#allocation6 + $0x1e]]  ;;  %s2129_s13 = sld [smem:[#allocation6 + $0xdb]] }
  0x9e   :  { %v2048_v29 = vpop.eup %1301  ;;  %1309 = vtanh.f32 %v720_v15  ;;  %v2052_v31 = vadd.f32 %v537_v13, %v1988_v49  ;;  %v565_v32 = vmul.f32 %v564_v43, %v563_v4  ;;  %v679_v33 = vstv %s2009_s14  ;;  %s2137_s15 = sld [smem:[#allocation6 + $0x3e]] }
  0x9f   :  { %v748_v34 = vadd.f32 %v747_v22, %v746_v18  ;;  %v625_v26 = vadd.f32 %v624_v17, %v597_v16  ;;  %v652_v35 = vmul.f32 %v1300_v23, %v651_v27  ;;  %1311 = vtanh.f32 %v725_v45  ;;  %s2139_s14 = sld [smem:[#allocation6 + $0x9e]] }
  0xa0   :  { %v753_v36 = vadd.f32 %v752_v28, %v751_v20  ;;  %v645_v37 = vadd.f32 %v644_v25, %v617_v24  ;;  %v672_v38 = vmul.f32 %v2048_v29, %v671_v30  ;;  %v773_v39 = vstv %s2018_s17  ;;  %s2141_s17 = sld [smem:[#allocation6 + $0x75]] }
  0xa1   :  { %v778_v19 = vstv %s2020_s19  ;;  %v774_v41 = vmul.f32 %v1905_v42, %v773_v39  ;;  %v775_v43 = vstv %s2027_s18  ;;  %v780_v46 = vstv %s2029_s20  ;;  %s2147_s19 = sld [smem:[#allocation6 + $0x5b]]  ;;  %s2151_s18 = sld [smem:[#allocation6 + $0xbe]] }
  0xa2   :  { %v1304_v40 = vpop.eup %1303  ;;  %v779_v44 = vmul.f32 %v1905_v42, %v778_v19  ;;  %v590_v48 = vmul.f32 %v1975_v1, %v1975_v1  ;;  %v699_v50 = vstv %s2031_s21  ;;  %v707_v51 = vstv %s2033_s22  ;;  %s2155_s20 = sld [smem:[#allocation6 + $0x1f]]  ;;  %s2158_s21 = sld [smem:[#allocation6 + $0xdc]] }
  0xa3   :  { %v2074_v49 = vpop.eup %1305  ;;  %1313 = vtanh.f32 %v748_v34  ;;  %v653_v52 = vadd.f32 %v652_v35, %v625_v26  ;;  %v801_v54 = vstv %s2039_s10  ;;  %v680_v55 = vmul.f32 %v1304_v40, %v679_v33  ;;  %s2166_s22 = sld [smem:[#allocation6 + $0x3f]] }
  0xa4   :  { %1315 = vtanh.f32 %v753_v36  ;;  %v781_v53 = vadd.f32 %v780_v46, %v779_v44  ;;  %v776_v56 = vadd.f32 %v775_v43, %v774_v41  ;;  %v806_v47 = vstv %s2044_s23  ;;  %s2168_s10 = sld [smem:[#allocation6 + $0x9f]]  ;;  %s2171_s23 = sld [smem:[#allocation6 + $0x5c]] }
  0xa5   :  { %v808_v57 = vstv %s2046_s16  ;;  %v1308_v1 = vpop.eup %1307  ;;  %v673_v59 = vadd.f32 %v672_v38, %v645_v37  ;;  %v700_v60 = vmul.f32 %v2074_v49, %v699_v50  ;;  %v802_v61 = vmul.f32 %v1905_v42, %v801_v54  ;;  %s2174_s16 = sld [smem:[#allocation6 + $0xbf]] }
  0xa6   :  { %v807_v62 = vmul.f32 %v1905_v42, %v806_v47  ;;  %v591_v63 = vsub.f32 1.0, %v590_v48  ;;  %v592_v0 = vstv %s2056_s1  ;;  %v803_v2 = vstv %s2059_s25  ;;  %s2177_s1 = sld [smem:[#allocation6 + $0xdd]]  ;;  %s2182_s25 = sld [smem:[#allocation6 + $0x76]] }
  0xa7   :  { %v2108_v3 = vmul.f32 %v2003_v58, %v2003_v58  ;;  %v727_v6 = vstv %s2061_s26  ;;  %1317 = vtanh.f32 %v781_v53  ;;  %v681_v8 = vadd.f32 %v680_v55, %v653_v52  ;;  %s2190_s26 = sld [smem:[#allocation6 + $0x5d]] }
  0xa8   :  { %v2104_v5 = vpop.eup %1309  ;;  %v809_v7 = vadd.f32 %v808_v57, %v807_v62  ;;  %v708_v9 = vmul.f32 %v1308_v1, %v707_v51  ;;  %1319 = vtanh.f32 %v776_v56  ;;  %v829_v10 = vstv %s2066_s28  ;;  %s2194_s28 = sld [smem:[#allocation6 + $0x77]] }
  0xa9   :  { %v1312_v11 = vpop.eup %1311  ;;  %v566_v13 = vadd.f32 %v565_v32, %v2052_v31  ;;  %v701_v4 = vadd.f32 %v700_v60, %v673_v59  ;;  %v735_v14 = vstv %s2068_s29  ;;  %v804_v58 = vadd.f32 %v803_v2, %v802_v61  ;;  %s2199_s29 = sld [smem:[#allocation6 + $0xde]] }
  0xaa   :  { %v728_v15 = vmul.f32 %v2104_v5, %v727_v6  ;;  %v830_v16 = vmul.f32 %v1905_v42, %v829_v10  ;;  %v831_v17 = vstv %s2080_s24  ;;  %v834_v18 = vstv %s2082_s30  ;;  %s2206_s24 = sld [smem:[#allocation6 + $0x5e]]  ;;  %s2214_s30 = sld [smem:[#allocation6 + $0x78]] }
  0xab   :  { %v593_v21 = vmul.f32 %v592_v0, %v591_v63  ;;  %v619_v45 = vsub.f32 1.0, %v2108_v3  ;;  %1321 = vtanh.f32 %v809_v7  ;;  %v835_v22 = vmul.f32 %v1905_v42, %v834_v18 }
  0xac   :  { %v709_v23 = vadd.f32 %v708_v9, %v681_v8  ;;  %v736_v24 = vmul.f32 %v1312_v11, %v735_v14  ;;  %v755_v25 = vstv %s2085_s3  ;;  %v836_v27 = vstv %s2089_s5  ;;  %s2220_s3 = sld [smem:[#allocation6 + $0x5f]] }
  0xad   :  { %v2132_v20 = vpop.eup %1313  ;;  %v763_v30 = vstv %s2092_s0  ;;  %1323 = vtanh.f32 %v804_v58  ;;  %v832_v31 = vadd.f32 %v831_v17, %v830_v16  ;;  %v837_v32 = vadd.f32 %v836_v27, %v835_v22  ;;  %s2222_s5 = sld [smem:[#allocation6 + $0xdf]]  ;;  %s2230_s0 = sld [smem:[#allocation6 + $0xe1]] }
  0xae   :  { %v1316_v28 = vpop.eup %1315  ;;  %v729_v33 = vadd.f32 %v728_v15, %v701_v4  ;;  %v857_v34 = vstv %s2096_s6  ;;  %v859_v26 = vstv %s2100_s7  ;;  %v862_v35 = vstv %s2102_s27  ;;  %s2232_s6 = sld [smem:[#allocation6 + $0x79]]  ;;  %s1208_s7 = sld [smem:[#allocation6 + $0xe0]] }
  0xaf   :  { %v756_v36 = vmul.f32 %v2132_v20, %v755_v25  ;;  %1325 = vtanh.f32 %v837_v32  ;;  %v858_v37 = vmul.f32 %v1905_v42, %v857_v34  ;;  %v863_v38 = vmul.f32 %v1905_v42, %v862_v35  ;;  %s1169_s27 = sld [smem:[#allocation6 + $0x7a]] }
  0xb0   :  { %v620_v39 = vstv %s2111_s9  ;;  %v737_v19 = vadd.f32 %v736_v24, %v709_v23  ;;  %v764_v40 = vmul.f32 %v1316_v28, %v763_v30  ;;  %v864_v41 = vstv %s2114_s8  ;;  %s1176_s9 = sld [smem:[#allocation6 + $0x7b]]  ;;  %s1183_s8 = sld [smem:[#allocation6 + $0x7c]] }
  0xb1   :  { %v1318_v43 = vpop.eup %1317  ;;  %v791_v44 = vstv %s2118_s11  ;;  %1327 = vtanh.f32 %v832_v31  ;;  %v860_v46 = vadd.f32 %v859_v26, %v858_v37  ;;  %v865_v48 = vadd.f32 %v864_v41, %v863_v38  ;;  %s1190_s11 = sld [smem:[#allocation6 + $0x7d]] }
  0xb2   :  { %v2160_v50 = vpop.eup %1319  ;;  %v646_v51 = vmul.f32 %v2022_v12, %v2022_v12  ;;  %v783_v52 = vstv %s2121_s4  ;;  %v885_v53 = vstv %s2126_s12  ;;  %v594_v54 = vadd.f32 %v593_v21, %v566_v13  ;;  %s1197_s4 = sld [smem:[#allocation6 + $0x7e]]  ;;  %s1204_s12 = sld [smem:[#allocation6 + $0x7f]] }
  0xb3   :  { %v621_v55 = vmul.f32 %v620_v39, %v619_v45  ;;  %v757_v56 = vadd.f32 %v756_v36, %v729_v33  ;;  %v819_v47 = vstv %s2129_s13  ;;  %v765_v57 = vadd.f32 %v764_v40, %v737_v19  ;;  %s1414_s13 = smov [#allocation7]  }
  0xb4   :  { %v792_v1 = vmul.f32 %v1318_v43, %v791_v44  ;;  %1329 = vtanh.f32 %v865_v48  ;;  %v886_v12 = vmul.f32 %v1905_v42, %v885_v53  ;;  %v784_v60 = vmul.f32 %v2160_v50, %v783_v52 }
  0xb5   :  { %v1322_v59 = vpop.eup %1321  ;;  %1331 = vtanh.f32 %v860_v46  ;;  %v887_v61 = vstv %s2137_s15  ;;  %v890_v62 = vstv %s2139_s14  ;;  %v647_v63 = vsub.f32 1.0, %v646_v51  ;;  %s975_s15 = sshll.u32 %s1414_s13, 4  ;;  %s976_s15 = int_to_ptr.vmem [resolvable:$true] %s975_s15 }
  0xb6   :  { %v648_v0 = vstv %s2141_s17  ;;  %v888_v2 = vadd.f32 %v887_v61, %v886_v12  ;;  %v891_v3 = vmul.f32 %v1905_v42, %v890_v62  ;;  %v622_v7 = vadd.f32 %v621_v55, %v594_v54  ;;  %s1384_s14 = scalar_lea.vmem %s976_s15, 32  ;;  %p1389_p0 = scmp.lt.s32.totalorder %s976_s15, %s976_s15 }
  0xb7   :  { %v2185_v6 = vpop.eup %1323  ;;  %v674_v8 = vmul.f32 %v2048_v29, %v2048_v29  ;;  %v811_v9 = vstv %s2147_s19  ;;  %v892_v10 = vstv %s2151_s18  ;;  %v793_v11 = vadd.f32 %v792_v1, %v765_v57  ;;  %p1385_p13 = scmp.ne.s32.totalorder %s976_s15, %s1384_s14  ;;  %p1390_p1 = scmp.lt.s32.totalorder %s1384_s14, %s1384_s14 }
  0xb8   :  { %v820_v13 = vmul.f32 %v1322_v59, %v819_v47  ;;  %v893_v4 = vadd.f32 %v892_v10, %v891_v3  ;;  %v913_v14 = vstv %s2155_s20  ;;  %v785_v15 = vadd.f32 %v784_v60, %v757_v56 }
  0xb9   :  { %v1326_v58 = vpop.eup %1325  ;;  %v847_v16 = vstv %s2158_s21  ;;  %1333 = vtanh.f32 %v888_v2  ;;  %v914_v29 = vmul.f32 %v1905_v42, %v913_v14  ;;  %v812_v17 = vmul.f32 %v2185_v6, %v811_v9  ;;  %p1391_p2 = por %p1390_p1, %p1389_p0 }
  0xba   :  { %1335 = vtanh.f32 %v893_v4  ;;  %v915_v18 = vstv %s2166_s22  ;;  %v918_v21 = vstv %s2168_s10  ;;  %v649_v22 = vmul.f32 %v648_v0, %v647_v63 }
  0xbb   :  { %v2203_v45 = vpop.eup %1327  ;;  %v839_v23 = vstv %s2171_s23  ;;  %v916_v24 = vadd.f32 %v915_v18, %v914_v29  ;;  %v919_v25 = vmul.f32 %v1905_v42, %v918_v21  ;;  %v675_v27 = vsub.f32 1.0, %v674_v8  ;;  %p1392_p3 = pnand %p1391_p2, %p1385_p13 }
  0xbc   :  { %v821_v28 = vadd.f32 %v820_v13, %v793_v11  ;;  %v848_v30 = vmul.f32 %v1326_v58, %v847_v16  ;;  %v920_v31 = vstv %s2174_s16  ;;  %v702_v32 = vmul.f32 %v2074_v49, %v2074_v49 }
  0xbd   :  { %v875_v33 = vstv %s2177_s1  ;;  %1337 = vtanh.f32 %v916_v24  ;;  %v921_v34 = vadd.f32 %v920_v31, %v919_v25  ;;  %v676_v35 = vstv %s2182_s25 }
  0xbe   :  { %v1330_v26 = vpop.eup %1329  ;;  %v813_v36 = vadd.f32 %v812_v17, %v785_v15  ;;  %v840_v37 = vmul.f32 %v2203_v45, %v839_v23  ;;  %v867_v38 = vstv %s2190_s26  ;;  %v849_v49 = vadd.f32 %v848_v30, %v821_v28 }
  0xbf   :  { %v2217_v42 = vpop.eup %1331  ;;  %1339 = vtanh.f32 %v921_v34  ;;  %v876_v39 = vmul.f32 %v1330_v26, %v875_v33  ;;  %v650_v19 = vadd.f32 %v649_v22, %v622_v7  ;;  %v677_v40 = vmul.f32 %v676_v35, %v675_v27 }
  0xc0   :  { %v703_v41 = vsub.f32 1.0, %v702_v32  ;;  %v704_v43 = vstv %s2194_s28  ;;  %v730_v44 = vmul.f32 %v2104_v5, %v2104_v5  ;;  %v841_v46 = vadd.f32 %v840_v37, %v813_v36 }
  0xc1   :  { %v868_v48 = vmul.f32 %v2217_v42, %v867_v38  ;;  %v903_v51 = vstv %s2199_s29  ;;  %v895_v53 = vstv %s2206_s24  ;;  %v877_v55 = vadd.f32 %v876_v39, %v849_v49 }
  0xc2   :  { %v678_v56 = vadd.f32 %v677_v40, %v650_v19  ;;  %v705_v47 = vmul.f32 %v704_v43, %v703_v41  ;;  %v731_v1 = vsub.f32 1.0, %v730_v44  ;;  %v732_v60 = vstv %s2214_s30 }
  0xc3   :  { %v1334_v52 = vpop.eup %1333  ;;  %v869_v5 = vadd.f32 %v868_v48, %v841_v46  ;;  %v758_v61 = vmul.f32 %v2132_v20, %v2132_v20  ;;  %v923_v62 = vstv %s2220_s3  ;;  %v931_v63 = vstv %s2222_s5 }
  0xc4   :  { %v1336_v54 = vpop.eup %1335  ;;  %v896_v12 = vmul.f32 %v1334_v52, %v895_v53  ;;  %v706_v3 = vadd.f32 %v705_v47, %v678_v56  ;;  %v733_v7 = vmul.f32 %v732_v60, %v731_v1  ;;  %v786_v13 = vmul.f32 %v2160_v50, %v2160_v50 }
  0xc5   :  { %v904_v57 = vmul.f32 %v1336_v54, %v903_v51  ;;  %v759_v11 = vsub.f32 1.0, %v758_v61  ;;  %v938_v4 = vstv %s2230_s0  ;;  %v760_v14 = vstv %s2232_s6 }
  0xc6   :  { %v897_v8 = vadd.f32 %v896_v12, %v869_v5  ;;  %v734_v20 = vadd.f32 %v733_v7, %v706_v3  ;;  %v787_v17 = vsub.f32 1.0, %v786_v13  ;;  %v814_v18 = vmul.f32 %v2185_v6, %v2185_v6 }
  0xc7   :  { %v1338_v59 = vpop.eup %1337  ;;  %v905_v0 = vadd.f32 %v904_v57, %v877_v55  ;;  %v761_v29 = vmul.f32 %v760_v14, %v759_v11  ;;  %v936_v21 = vstv %s1208_s7  ;;  %v788_v22 = vstv %s1169_s27 }
  0xc8   :  { %v924_v9 = vmul.f32 %v1338_v59, %v923_v62  ;;  %v789_v50 = vmul.f32 %v788_v22, %v787_v17  ;;  %v815_v28 = vsub.f32 1.0, %v814_v18  ;;  %v842_v30 = vmul.f32 %v2203_v45, %v2203_v45 }
  0xc9   :  { %v1340_v2 = vpop.eup %1339  ;;  %v762_v27 = vadd.f32 %v761_v29, %v734_v20  ;;  %v816_v31 = vstv %s1176_s9  ;;  %v870_v35 = vmul.f32 %v2217_v42, %v2217_v42  ;;  %v844_v36 = vstv %s1183_s8 }
  0xca   :  { %v932_v10 = vmul.f32 %v1340_v2, %v931_v63  ;;  %v925_v15 = vadd.f32 %v924_v9, %v897_v8  ;;  %v817_v26 = vmul.f32 %v816_v31, %v815_v28  ;;  %v843_v6 = vsub.f32 1.0, %v842_v30 }
  0xcb   :  { %v790_v34 = vadd.f32 %v789_v50, %v762_v27  ;;  %v871_v49 = vsub.f32 1.0, %v870_v35  ;;  %v898_v39 = vmul.f32 %v1334_v52, %v1334_v52  ;;  %v872_v19 = vstv %s1190_s11 }
  0xcc   :  { %v933_v58 = vadd.f32 %v932_v10, %v905_v0  ;;  %v937_v24 = vadd.f32 %v936_v21, %v925_v15  ;;  %v845_v38 = vmul.f32 %v844_v36, %v843_v6  ;;  %v926_v43 = vmul.f32 %v1338_v59, %v1338_v59 }
  0xcd   :  { %v818_v37 = vadd.f32 %v817_v26, %v790_v34  ;;  %v873_v40 = vmul.f32 %v872_v19, %v871_v49  ;;  %v899_v41 = vsub.f32 1.0, %v898_v39  ;;  %v900_v46 = vstv %s1197_s4 }
  0xce   :  { %v939_v16 = vadd.f32 %v938_v4, %v933_v58  ;;  %v955_v33 = vmul.f32 0.5, %v937_v24  ;;  %v927_v54 = vsub.f32 1.0, %v926_v43  ;;  %v928_v55 = vstv %s1204_s12 }
  0xcf   :  { %v846_v45 = vadd.f32 %v845_v38, %v818_v37  ;;  %v901_v53 = vmul.f32 %v900_v46, %v899_v41 }
  0xd0   :  { %v941_v23 = vand.u32 2147483647, %v939_v16  ;;  %v929_v57 = vmul.f32 %v928_v55, %v927_v54  ;;  %v940_v59 = vmax.f32 %v939_v16, 0.0 }
  0xd1   :  { %v874_v51 = vadd.f32 %v873_v40, %v846_v45 }
  0xd2   :  { %v942_v25 = vsub.f32 0.0, %v941_v23 }
  0xd3   :  { %v902_v47 = vadd.f32 %v901_v53, %v874_v51 }
  0xd4   :  { %v943_v32 = vmul.f32 1.442695, %v942_v25 }
  0xd5   :  { %v930_v12 = vadd.f32 %v929_v57, %v902_v47 }
  0xd6   :  { %1341 = vpow2.f32 %v943_v32 }
  0xd7   :  { %1343 = vtanh.f32 %v955_v33 }
  0xe0   :  { %v1342_v44 = vpop.eup %1341 }
  0xe1   :  { %v945_v48 = vadd.f32 1.0, %v1342_v44  ;;  %v1344_v42 = vpop.eup %1343  ;;  %v948_v56 = vmul.f32 -0.5, %v1342_v44  ;;  %v951_v5 = vand.u32 2147483647, %v1342_v44 }
  0xe2   :  { %v957_v1 = vadd.f32 1.0, %v1344_v42 }
  0xe3   :  { %1345 = vlog2.f32 %v945_v48  ;;  %v949_v52 = vadd.f32 1.0, %v948_v56  ;;  %vm952_vm0 = vcmp.lt.f32.partialorder %v951_v5, 0.0004427343 }
  0xe4   :  { %v958_v60 = vmul.f32 0.5, %v957_v1 }
  0xe5   :  { %v950_v61 = vmul.f32 %v1342_v44, %v949_v52 }
  0xe6   :  { %v959_v0 = vmul.f32 %v958_v60, %v930_v12 }
  0xed   :  { %v1346_v62 = vpop.eup %1345 }
  0xee   :  { %v947_v63 = vmul.f32 0.6931472, %v1346_v62 }
  0xf0   :  { %v953_v2 = vsel %vm952_vm0, %v950_v61, %v947_v63 }
  0xf1   :  { %v954_v3 = vadd.f32 %v953_v2, %v940_v59 }
  0xf3   :  { %v960_v7 = vmul.f32 %v959_v0, %v954_v3 }
  0xf5   :  { %1347 = vrsqrt.f32 %v960_v7  ;;  %vm963_vm1 = vcmp.eq.f32.partialorder %v960_v7, inf  ;;  %v966_v9 = vand.u32 2147483648, %v960_v7  ;;  %vm965_vm2 = vcmp.eq.f32.partialorder %v960_v7, 0.0 }
  0xff   :  { %v1348_v8 = vpop.eup %1347 }
 0x100   :  { %v962_v10 = vmul.f32 %v1348_v8, %v960_v7 }
 0x102   :  { %v964_v11 = vsel %vm963_vm1, %v960_v7, %v962_v10 }
 0x103   :  { %v967_v13 = vsel %vm965_vm2, %v966_v9, %v964_v11 }
 0x104   :  { %968 = vst [vmem:[#allocation7] sm:$0x3] %v967_v13 }
 0x105   :  { %1395 = shalt.err (!%p1392_p3)
}
 0x106   :  { %s1396_s18 = scalar_lea.hbm %s2263_s2, 32 }
 0x107   :  { %p1397_p4 = scmp.ne.s32.totalorder %s2263_s2, %s1396_s18  ;;  %p1400_p5 = scmp.lt.u32.totalorder %s1396_s18, %s2263_s2 }
 0x109   :  { %p1402_p6 = pnand %p1400_p5, %p1397_p4 }
 0x10b   :  { %1405 = shalt.err (!%p1402_p6)
}
 0x10c   :  { %978 = dma.vmem_to_hbm [thread:$0]  %s976_s15, 32, %s2263_s2, [#allocation4]  }
 0x10d   :  { %1410 = dma.done.wait [#allocation4], 32  }
 0x10e   :  { %1411 = vsyncadd [#allocation4], 4294967264 }
 0x10f   :  { %982 = vsyncpa [#allocation3], 1 }
 0x110   :  { %983 = vsyncpa [#allocation4], 1 }
 0x111   :  { %984 = vsyncpa [#allocation5], 1 }

</bundles_post_ra>
